<compile_context>
chip_gen: v6e
topology: v6e:2x2x1
jax: 0.10.0
libtpu: 0.0.40
codegen_flags: <defaults>
</compile_context>

<pallas_src>
import functools

import jax
import jax.numpy as jnp
from jax.experimental import pallas as pl
from jax.experimental.pallas import tpu as pltpu


def _round_up(x, m):
    return (x + m - 1) // m * m


KERNEL_LIST = (3, 4, 5)
FILTER_NUM = 100
KMAX = max(KERNEL_LIST)
F_PAD = _round_up(FILTER_NUM, 128)        # lane-dense filter count (100 -> 128)
NF = len(KERNEL_LIST) * F_PAD             # all conv groups side by side on the lane axis


def _choose_batch_tile(batch, seq_pad):
    """Examples per grid step.  Target M = batch_tile*seq_pad ~ 2048 rows (review:
    1024-4096) to amortize the ~0.35us/step overhead; don't pad tiny batches up to a
    huge tile; keep >= 2 grid steps when the batch allows it (v7x has 2 TensorCores)."""
    bt = max(8, min(256, (2048 // seq_pad) // 8 * 8))
    bt = min(bt, max(8, _round_up(batch, 8)))
    if batch >= 16:
        bt = min(bt, max(8, _round_up((batch + 1) // 2, 8)))
    return bt


def _textcnn_kernel(emb_ref, w_ref, b_ref, mask_ref, fcw_ref, fcb_ref,
                    out_ref, cols_ref, *, seq_pad):
    """One batch tile:
         im2col (sublane-shifted taps into 128-aligned lane groups, bf16)
      -> ONE fused MXU matmul over every conv width & filter (bf16 in, f32 acc)
      -> bias + ReLU + time-mask + max-pool fused into a single reshaped reduce
      -> Linear(3F, 1) via a small transposed-B matmul -> lane-dense (1, TB) store.
    """
    M, E = emb_ref.shape                      # M = batch_tile * seq_pad
    TB = M // seq_pad
    e_pad = cols_ref.shape[1] // KMAX         # per-tap lane group (multiple of 128)
    nf = w_ref.shape[1]

    # One-time init: zero the scratch so the padding lanes [E, e_pad) of every tap
    # group and the shifted tap tails stay zero/finite forever (the scratch persists
    # across grid steps and those regions are never rewritten below).
    @pl.when(pl.program_id(0) == 0)
    def _():
        cols_ref[...] = jnp.zeros_like(cols_ref)

    # --- im2col straight in bf16: tap dk = rows shifted up by dk, stored into the
    #     128-aligned lane group [dk*e_pad, dk*e_pad + E).  No cast passes, no lane
    #     shuffles on the stores.  Tail rows of shifted taps are stale-but-finite and
    #     only ever feed time-masked conv positions.
    cols_ref[:, 0:E] = emb_ref[...]
    for dk in range(1, KMAX):
        lo = dk * e_pad
        cols_ref[0:M - dk, lo:lo + E] = emb_ref[pl.ds(dk, M - dk), :]

    # --- one MXU matmul covering every conv width and every filter:
    #     (M, KMAX*e_pad) @ (KMAX*e_pad, NF), bf16 inputs, f32 accumulation.
    acc = jnp.dot(cols_ref[...], w_ref[...],
                  preferred_element_type=jnp.float32)              # (M, NF) f32

    # --- fused epilogue: bias + ReLU + time-mask + max-pool over time in one pass.
    #     (M, NF) -> (TB, seq_pad, NF) is a free sublane split (seq_pad % 8 == 0).
    #     mask is 1.0 on valid conv positions (t < L - k + 1 for that lane's group),
    #     0.0 elsewhere; ReLU >= 0 so multiplying by the mask is exactly "drop
    #     invalid window positions" before the max.
    acc3 = acc.reshape(TB, seq_pad, nf)
    act = jnp.maximum(acc3 + b_ref[...], 0.0) * mask_ref[...]
    pooled = jnp.max(act, axis=1)                                   # (TB, NF) f32

    # TODO(synk): nn.Dropout omitted — identity in eval/inference mode.

    # --- Linear(3F, 1): contract the filter axis of both operands so the logits come
    #     out along the lane axis (lane-dense (1, TB) store).  fcw is replicated to 8
    #     rows so the lhs is a full sublane tile; padded filter lanes have zero fc
    #     weights and contribute nothing.
    logit8 = jax.lax.dot_general(fcw_ref[...], pooled,
                                 dimension_numbers=(((1,), (1,)), ((), ())),
                                 preferred_element_type=jnp.float32)  # (8, TB)
    out_ref[...] = (logit8[0:1, :] + fcb_ref[...]).astype(out_ref.dtype)


def init_params(key, vocab_size, embedding_dim, filter_num=FILTER_NUM):
    """PyTorch-layout parameters: conv{k}_w (F, k, E) (Conv2d weight sans the unit
    in-channel), conv{k}_b (F,), fc_w (1, 3F), fc_b (1,)."""
    keys = jax.random.split(key, 3 + 2 * len(KERNEL_LIST))
    params = {
        "embedding": jax.random.normal(keys[0], (vocab_size, embedding_dim), jnp.float32),
        "fc_w": 0.05 * jax.random.normal(
            keys[1], (1, len(KERNEL_LIST) * filter_num), jnp.float32),
        "fc_b": 0.05 * jax.random.normal(keys[2], (1,), jnp.float32),
    }
    for i, k in enumerate(KERNEL_LIST):
        params[f"conv{k}_w"] = 0.05 * jax.random.normal(
            keys[3 + 2 * i], (filter_num, k, embedding_dim), jnp.float32)
        params[f"conv{k}_b"] = 0.05 * jax.random.normal(
            keys[4 + 2 * i], (filter_num,), jnp.float32)
    return params


def pack_params(params):
    """Repack PyTorch-layout weights into the fused, lane-dense kernel layout."""
    E = params["embedding"].shape[1]
    F = params[f"conv{KERNEL_LIST[0]}_w"].shape[0]
    E_pad = _round_up(E, 128)                 # per-tap lane group in cols/weights only
    w_blocks, b_blocks, fc_blocks = [], [], []
    fc_w = params["fc_w"]
    for g, k in enumerate(KERNEL_LIST):
        w = params[f"conv{k}_w"]                               # (F, k, E)
        w_taps = jnp.transpose(w, (1, 2, 0))                   # (k, E, F)
        w_full = jnp.zeros((KMAX * E_pad, F_PAD), jnp.float32)
        for dk in range(k):
            w_full = w_full.at[dk * E_pad:dk * E_pad + E, :F].set(w_taps[dk])
        w_blocks.append(w_full)
        b_blocks.append(jnp.pad(params[f"conv{k}_b"], (0, F_PAD - F)).reshape(1, F_PAD))
        fc_blocks.append(jnp.pad(fc_w[0, g * F:(g + 1) * F], (0, F_PAD - F)).reshape(1, F_PAD))
    fcw_row = jnp.concatenate(fc_blocks, axis=1)               # (1, NF)
    return {
        "embedding": params["embedding"].astype(jnp.bfloat16),            # bf16 gather
        "w_all": jnp.concatenate(w_blocks, axis=1).astype(jnp.bfloat16),  # (KMAX*E_pad, NF)
        "b_all": jnp.concatenate(b_blocks, axis=1),                       # (1, NF) f32
        "fc_w": jnp.tile(fcw_row, (8, 1)),                                # (8, NF) f32 (replicated)
        "fc_b": params["fc_b"].reshape(1, 1),                             # (1, 1) f32
    }


@jax.jit
def textcnn_forward(token_ids, packed):
    B, L = token_ids.shape
    E = packed["embedding"].shape[1]
    assert L >= KMAX, "sequence must be at least as long as the widest conv kernel"

    L_pad = _round_up(L, 8)                   # keep the time axis sublane-aligned
    bt = _choose_batch_tile(B, L_pad)         # examples per grid step
    B_pad = _round_up(B, bt)
    n_tiles = B_pad // bt
    M = bt * L_pad                            # MXU M dim per grid step
    KE = packed["w_all"].shape[0]             # KMAX * E_pad (contraction dim)

    # Embedding gather stays in XLA (bf16 table -> bf16 activations).
    # TODO(synk): the gather could be fused into the kernel with
    # PrefetchScalarGridSpec (token ids in SMEM + VMEM-resident table / per-row DMA
    # gather) to cut HBM traffic to ids-only; kept in XLA here.
    emb = jnp.take(packed["embedding"], token_ids, axis=0)      # (B, L, E) bf16
    emb = jnp.pad(emb, ((0, B_pad - B), (0, L_pad - L), (0, 0)))
    emb2d = emb.reshape(B_pad * L_pad, E)                       # flatten batch*time

    # time-validity mask: 1.0 where t < L - k + 1 for that lane's conv group.
    tpos = jnp.arange(L_pad)[:, None]
    mask = jnp.concatenate(
        [jnp.broadcast_to(tpos < (L - k + 1), (L_pad, F_PAD)) for k in KERNEL_LIST],
        axis=1).astype(jnp.float32)                             # (L_pad, NF)

    out = pl.pallas_call(
        functools.partial(_textcnn_kernel, seq_pad=L_pad),
        out_shape=jax.ShapeDtypeStruct((n_tiles, bt), jnp.float32),
        grid=(n_tiles,),
        in_specs=[
            pl.BlockSpec((M, E), lambda i: (i, 0)),             # embedded batch tile
            pl.BlockSpec((KE, NF), lambda i: (0, 0)),           # fused conv weights (resident)
            pl.BlockSpec((1, NF), lambda i: (0, 0)),            # conv biases
            pl.BlockSpec((L_pad, NF), lambda i: (0, 0)),        # time-validity mask
            pl.BlockSpec((8, NF), lambda i: (0, 0)),            # fc weights (replicated rows)
            pl.BlockSpec((1, 1), lambda i: (0, 0)),             # fc bias
        ],
        out_specs=pl.BlockSpec((1, bt), lambda i: (i, 0)),      # lane-dense logits
        scratch_shapes=[
            pltpu.VMEM((M, KE), jnp.bfloat16),                  # bf16 im2col buffer
        ],
        compiler_params=pltpu.CompilerParams(
            dimension_semantics=("parallel",),                  # batch tiles across cores
            vmem_limit_bytes=48 * 1024 * 1024,                  # fits v7x's 64 MiB w/ headroom
        ),
    )(emb2d, packed["w_all"], packed["b_all"], mask, packed["fc_w"], packed["fc_b"])

    return out.reshape(B_pad)[:B].reshape(B, 1)


def textcnn_reference(token_ids, params):
    """Pure-JAX f32 reference matching the PyTorch module in eval mode."""
    emb = jnp.take(params["embedding"], token_ids, axis=0)           # (B, L, E)
    L = emb.shape[1]
    feats = []
    for k in KERNEL_LIST:
        w = params[f"conv{k}_w"]                                      # (F, k, E)
        b = params[f"conv{k}_b"]                                      # (F,)
        Lp = L - k + 1
        win = jnp.stack([emb[:, dk:dk + Lp, :] for dk in range(k)], axis=2)  # (B, Lp, k, E)
        conv = jnp.einsum("btke,fke->btf", win, w) + b                # (B, Lp, F)
        feats.append(jnp.max(jax.nn.relu(conv), axis=1))              # (B, F)
    feat = jnp.concatenate(feats, axis=1)                             # (B, 3F)
    return feat @ params["fc_w"].T + params["fc_b"]                   # (B, 1)


if __name__ == "__main__":
    vocab_size, embedding_dim = 50, 32
    B, L = 2, 16

    key = jax.random.PRNGKey(0)
    k_tok, k_par = jax.random.split(key)
    params = init_params(k_par, vocab_size, embedding_dim)
    tokens = jax.random.randint(k_tok, (B, L), 0, vocab_size, dtype=jnp.int32)

    packed = pack_params(params)
    logits = textcnn_forward(tokens, packed)
    jax.block_until_ready(logits)

    assert logits.shape == (B, 1) and logits.dtype == jnp.float32
    ref = textcnn_reference(tokens, params)
    assert bool(jnp.allclose(logits, ref, atol=5e-2, rtol=5e-2)), (logits, ref)
    print("KERNEL_OK")
</pallas_src>

<mosaic_0001>
module attributes {stable_mosaic.version = 11 : i64} {
  func.func @_textcnn_kernel(%arg0: i32, %arg1: memref<128x32xbf16, #tpu.memory_space<vmem>>, %arg2: memref<640x384xbf16, #tpu.memory_space<vmem>>, %arg3: memref<1x384xf32, #tpu.memory_space<vmem>>, %arg4: memref<16x384xf32, #tpu.memory_space<vmem>>, %arg5: memref<8x384xf32, #tpu.memory_space<vmem>>, %arg6: memref<1x1xf32, #tpu.memory_space<vmem>>, %arg7: memref<1x8xf32, #tpu.memory_space<vmem>>, %arg8: memref<128x640xbf16, #tpu.memory_space<vmem>>) attributes {dimension_semantics = [#tpu.dimension_semantics<parallel>], iteration_bounds = array<i64: 1>, scalar_prefetch = 0 : i64, scratch_operands = 1 : i64, tpu.core_type = #tpu.core_type<tc>, window_params = [{transform_indices = @transform_0, window_bounds = array<i64: 128, 32>}, {pipeline_mode = #tpu.pipeline_mode<synchronous>, transform_indices = @transform_1, window_bounds = array<i64: 640, 384>}, {pipeline_mode = #tpu.pipeline_mode<synchronous>, transform_indices = @transform_2, window_bounds = array<i64: 1, 384>}, {pipeline_mode = #tpu.pipeline_mode<synchronous>, transform_indices = @transform_3, window_bounds = array<i64: 16, 384>}, {pipeline_mode = #tpu.pipeline_mode<synchronous>, transform_indices = @transform_4, window_bounds = array<i64: 8, 384>}, {pipeline_mode = #tpu.pipeline_mode<synchronous>, transform_indices = @transform_5, window_bounds = array<i64: 1, 1>}, {transform_indices = @transform_6, window_bounds = array<i64: 1, 8>}]} {
    %c0_i32 = arith.constant 0 : i32
    %0 = arith.cmpi eq, %arg0, %c0_i32 : i32
    %1 = arith.extui %0 : i1 to i32
    %c0_i32_0 = arith.constant 0 : i32
    %2 = arith.cmpi ne, %1, %c0_i32_0 : i32
    scf.if %2 {
      %cst_29 = arith.constant 0.000000e+00 : bf16
      %35 = vector.broadcast %cst_29 : bf16 to vector<128x640xbf16>
      %c0_30 = arith.constant 0 : index
      %c0_31 = arith.constant 0 : index
      %36 = vector.load %arg8[%c0_30, %c0_31] : memref<128x640xbf16, #tpu.memory_space<vmem>>, vector<128x640xbf16>
      tpu.vector_store %arg8[%c0_30, %c0_31], %35 {strides = array<i32>} : memref<128x640xbf16, #tpu.memory_space<vmem>>, vector<128x640xbf16>,
    } else {
    }
    %c0 = arith.constant 0 : index
    %c0_1 = arith.constant 0 : index
    %3 = vector.load %arg1[%c0, %c0_1] : memref<128x32xbf16, #tpu.memory_space<vmem>>, vector<128x32xbf16>
    %c0_2 = arith.constant 0 : index
    %c0_3 = arith.constant 0 : index
    %4 = vector.load %arg8[%c0_2, %c0_3] : memref<128x640xbf16, #tpu.memory_space<vmem>>, vector<128x32xbf16>
    tpu.vector_store %arg8[%c0_2, %c0_3], %3 {strides = array<i32>} : memref<128x640xbf16, #tpu.memory_space<vmem>>, vector<128x32xbf16>,
    %c1 = arith.constant 1 : index
    %c0_4 = arith.constant 0 : index
    %5 = vector.load %arg1[%c1, %c0_4] : memref<128x32xbf16, #tpu.memory_space<vmem>>, vector<127x32xbf16>
    %c0_5 = arith.constant 0 : index
    %c128 = arith.constant 128 : index
    %6 = vector.load %arg8[%c0_5, %c128] : memref<128x640xbf16, #tpu.memory_space<vmem>>, vector<127x32xbf16>
    tpu.vector_store %arg8[%c0_5, %c128], %5 {strides = array<i32>} : memref<128x640xbf16, #tpu.memory_space<vmem>>, vector<127x32xbf16>,
    %c2 = arith.constant 2 : index
    %c0_6 = arith.constant 0 : index
    %7 = vector.load %arg1[%c2, %c0_6] : memref<128x32xbf16, #tpu.memory_space<vmem>>, vector<126x32xbf16>
    %c0_7 = arith.constant 0 : index
    %c256 = arith.constant 256 : index
    %8 = vector.load %arg8[%c0_7, %c256] : memref<128x640xbf16, #tpu.memory_space<vmem>>, vector<126x32xbf16>
    tpu.vector_store %arg8[%c0_7, %c256], %7 {strides = array<i32>} : memref<128x640xbf16, #tpu.memory_space<vmem>>, vector<126x32xbf16>,
    %c3 = arith.constant 3 : index
    %c0_8 = arith.constant 0 : index
    %9 = vector.load %arg1[%c3, %c0_8] : memref<128x32xbf16, #tpu.memory_space<vmem>>, vector<125x32xbf16>
    %c0_9 = arith.constant 0 : index
    %c384 = arith.constant 384 : index
    %10 = vector.load %arg8[%c0_9, %c384] : memref<128x640xbf16, #tpu.memory_space<vmem>>, vector<125x32xbf16>
    tpu.vector_store %arg8[%c0_9, %c384], %9 {strides = array<i32>} : memref<128x640xbf16, #tpu.memory_space<vmem>>, vector<125x32xbf16>,
    %c4 = arith.constant 4 : index
    %c0_10 = arith.constant 0 : index
    %11 = vector.load %arg1[%c4, %c0_10] : memref<128x32xbf16, #tpu.memory_space<vmem>>, vector<124x32xbf16>
    %c0_11 = arith.constant 0 : index
    %c512 = arith.constant 512 : index
    %12 = vector.load %arg8[%c0_11, %c512] : memref<128x640xbf16, #tpu.memory_space<vmem>>, vector<124x32xbf16>
    tpu.vector_store %arg8[%c0_11, %c512], %11 {strides = array<i32>} : memref<128x640xbf16, #tpu.memory_space<vmem>>, vector<124x32xbf16>,
    %c0_12 = arith.constant 0 : index
    %c0_13 = arith.constant 0 : index
    %13 = vector.load %arg8[%c0_12, %c0_13] : memref<128x640xbf16, #tpu.memory_space<vmem>>, vector<128x640xbf16>
    %c0_14 = arith.constant 0 : index
    %c0_15 = arith.constant 0 : index
    %14 = vector.load %arg2[%c0_14, %c0_15] : memref<640x384xbf16, #tpu.memory_space<vmem>>, vector<640x384xbf16>
    %cst = arith.constant dense<0.000000e+00> : vector<128x384xf32>
    %15 = tpu.matmul %13, %14, %cst {dimension_numbers = #tpu.dot_dimension_numbers<[1], [0], [0], [1], [0, 0, 1, 1], [], []>} : vector<128x640xbf16>, vector<640x384xbf16>, vector<128x384xf32> -> vector<128x384xf32>
    %16 = vector.shape_cast %15 : vector<128x384xf32> to vector<8x16x384xf32>
    %c0_16 = arith.constant 0 : index
    %c0_17 = arith.constant 0 : index
    %17 = vector.load %arg3[%c0_16, %c0_17] : memref<1x384xf32, #tpu.memory_space<vmem>>, vector<1x384xf32>
    %18 = vector.shape_cast %17 : vector<1x384xf32> to vector<1x1x384xf32>
    %19 = vector.broadcast %18 : vector<1x1x384xf32> to vector<8x16x384xf32>
    %20 = arith.addf %16, %19 : vector<8x16x384xf32>
    %cst_18 = arith.constant 0.000000e+00 : f32
    %21 = vector.broadcast %cst_18 : f32 to vector<8x16x384xf32>
    %22 = arith.maximumf %20, %21 : vector<8x16x384xf32>
    %c0_19 = arith.constant 0 : index
    %c0_20 = arith.constant 0 : index
    %23 = vector.load %arg4[%c0_19, %c0_20] : memref<16x384xf32, #tpu.memory_space<vmem>>, vector<16x384xf32>
    %24 = vector.shape_cast %23 : vector<16x384xf32> to vector<1x16x384xf32>
    %25 = vector.broadcast %24 : vector<1x16x384xf32> to vector<8x16x384xf32>
    %26 = arith.mulf %22, %25 : vector<8x16x384xf32>
    %cst_21 = arith.constant dense<0xFF800000> : vector<8x384xf32>
    %27 = vector.multi_reduction <maximumf>, %26, %cst_21 [1] : vector<8x16x384xf32> to vector<8x384xf32>
    %c0_22 = arith.constant 0 : index
    %c0_23 = arith.constant 0 : index
    %28 = vector.load %arg5[%c0_22, %c0_23] : memref<8x384xf32, #tpu.memory_space<vmem>>, vector<8x384xf32>
    %cst_24 = arith.constant dense<0.000000e+00> : vector<8x8xf32>
    %29 = tpu.matmul %28, %27, %cst_24 {dimension_numbers = #tpu.dot_dimension_numbers<[1], [1], [0], [0], [0, 0, 1, 0], [], []>} : vector<8x384xf32>, vector<8x384xf32>, vector<8x8xf32> -> vector<8x8xf32>
    %30 = vector.extract_strided_slice %29 {offsets = [0, 0], sizes = [1, 8], strides = [1, 1]} : vector<8x8xf32> to vector<1x8xf32>
    %c0_25 = arith.constant 0 : index
    %c0_26 = arith.constant 0 : index
    %31 = vector.load %arg6[%c0_25, %c0_26] : memref<1x1xf32, #tpu.memory_space<vmem>>, vector<1x1xf32>
    %32 = vector.broadcast %31 : vector<1x1xf32> to vector<1x8xf32>
    %33 = arith.addf %30, %32 : vector<1x8xf32>
    %c0_27 = arith.constant 0 : index
    %c0_28 = arith.constant 0 : index
    %34 = vector.load %arg7[%c0_27, %c0_28] : memref<1x8xf32, #tpu.memory_space<vmem>>, vector<1x8xf32>
    tpu.vector_store %arg7[%c0_27, %c0_28], %33 {strides = array<i32>} : memref<1x8xf32, #tpu.memory_space<vmem>>, vector<1x8xf32>,
    return
  }
  func.func @transform_0(%arg0: i32) -> (i32, i32) {
    %c0_i32 = arith.constant 0 : i32
    %c0_i32_0 = arith.constant 0 : i32
    return %arg0, %c0_i32 : i32, i32
  }
  func.func @transform_1(%arg0: i32) -> (i32, i32) {
    %c0_i32 = arith.constant 0 : i32
    %c0_i32_0 = arith.constant 0 : i32
    %c0_i32_1 = arith.constant 0 : i32
    return %c0_i32, %c0_i32_0 : i32, i32
  }
  func.func @transform_2(%arg0: i32) -> (i32, i32) {
    %c0_i32 = arith.constant 0 : i32
    %c0_i32_0 = arith.constant 0 : i32
    %c0_i32_1 = arith.constant 0 : i32
    return %c0_i32, %c0_i32_0 : i32, i32
  }
  func.func @transform_3(%arg0: i32) -> (i32, i32) {
    %c0_i32 = arith.constant 0 : i32
    %c0_i32_0 = arith.constant 0 : i32
    %c0_i32_1 = arith.constant 0 : i32
    return %c0_i32, %c0_i32_0 : i32, i32
  }
  func.func @transform_4(%arg0: i32) -> (i32, i32) {
    %c0_i32 = arith.constant 0 : i32
    %c0_i32_0 = arith.constant 0 : i32
    %c0_i32_1 = arith.constant 0 : i32
    return %c0_i32, %c0_i32_0 : i32, i32
  }
  func.func @transform_5(%arg0: i32) -> (i32, i32) {
    %c0_i32 = arith.constant 0 : i32
    %c0_i32_0 = arith.constant 0 : i32
    %c0_i32_1 = arith.constant 0 : i32
    return %c0_i32, %c0_i32_0 : i32, i32
  }
  func.func @transform_6(%arg0: i32) -> (i32, i32) {
    %c0_i32 = arith.constant 0 : i32
    %c0_i32_0 = arith.constant 0 : i32
    return %arg0, %c0_i32 : i32, i32
  }
}

</mosaic_0001>

<bundles_post_ra>
// kernel: textcnn_forward.1
= control target key start
LH: loop header
LB: loop body
LE: loop exit
PB: predicated region body
PF: predicated region fallthrough
CT: control target
= control target key end

     0   :  { %s4871_s0 = inlined_call_operand.vmem [shape: bf16[128,32], index: 0, kind: input, shape index: {}]   ;;  %s4872_s1 = inlined_call_operand.hbm [shape: bf16[640,384], index: 1, kind: input, shape index: {}]   ;;  %s4873_s2 = inlined_call_operand.vmem [shape: f32[1,384], index: 2, kind: input, shape index: {}]   ;;  %s4874_s3 = inlined_call_operand.vmem [shape: f32[16,384], index: 3, kind: input, shape index: {}]   ;;  %s4875_s4 = inlined_call_operand.vmem [shape: f32[8,384], index: 4, kind: input, shape index: {}]   ;;  %s4876_s5 = inlined_call_operand.<no memory space> [shape: f32[1,1], index: 5, kind: input, shape index: {}]   ;;  %s4877_s6 = inlined_call_operand.vmem [shape: f32[1,8], index: 6, kind: output, shape index: {}]  }
   0x1   :  { %v11_v0 = vstv %s4876_s5 }
   0x2   :  { %12 = vst [vmem:[#allocation3] sm:$0x1] %v11_v0 }
   0x3   :  { %13 = vsyncpa [#allocation5], 0  ;;  %s3612_s23 = smov [#allocation4]  }
   0x4   :  { %s21_s24 = sshll.u32 %s3612_s23, 4  ;;  %s22_s24 = int_to_ptr.vmem [resolvable:$true] %s21_s24 }
   0x5   :  { %s3598_s25 = scalar_lea.vmem %s22_s24, 15360  ;;  %p3603_p1 = scmp.lt.s32.totalorder %s22_s24, %s22_s24 }
   0x6   :  { %p3599_p0 = scmp.ne.s32.totalorder %s22_s24, %s3598_s25  ;;  %p3604_p2 = scmp.lt.s32.totalorder %s3598_s25, %s3598_s25 }
   0x8   :  { %p3605_p3 = por %p3604_p2, %p3603_p1 }
   0xa   :  { %p3606_p4 = pnand %p3605_p3, %p3599_p0 }
   0xc   :  { %3609 = shalt.err (!%p3606_p4)
}
   0xd   :  { %s3613_s26 = smov 192   ;;  %s3614_s27 = smov 12  }
   0xe   :  { %27 = dma.hbm_to_vmem [thread:$0]  %s4872_s1, 15360, %s22_s24, [#allocation5], %s3613_s26, %s3613_s26, %s3614_s27  }
   0xf   :  { %3610 = dma.done.wait [#allocation5], 15360  }
  0x10   :  { %3611 = vsyncadd [#allocation5], 4294951936  ;;  %v3615_v1 = vmov 0   ;;  %v3372_v2 = vld [vmem:[#allocation4 + $0xac] ss:$12 sps:$4 sm:$0xff]   ;;  %vm108_vm0 = vcmask 257024  }
  0x11   :  { %44 = vst [vmem:[#allocation2] sm:$0xff] %v3615_v1  ;;  %47 = vst [vmem:[#allocation2 + $0x14] sm:$0xff] %v3615_v1  ;;  %3371 = vset.pattern.permute.xlu0 %v3615_v1  ;;  %v3374_v3 = vld [vmem:[#allocation4 + $0x22c] ss:$12 sps:$4 sm:$0xff]   ;;  %1839 = vmatprep.subr.bf16.mxu0 %v3372_v2  ;;  %v3376_v4 = vld [vmem:[#allocation4 + $0xa8] ss:$12 sps:$4 sm:$0xff]  }
  0x12   :  { %45 = vst [vmem:[#allocation2 + $0x8] sm:$0xff] %v3615_v1  ;;  %46 = vst [vmem:[#allocation2 + $0x10] sm:$0xf] %v3615_v1  ;;  %v3377_v5 = vld [vmem:[#allocation4 + $0x228] ss:$12 sps:$4 sm:$0xff]   ;;  %1952 = vmatprep.subr.bf16.mxu1 %v3374_v3  ;;  %1840 = vmatpush1.bf16.msra.mxu0 %v3376_v4  ;;  %vm371_vm3 = vcmask 1042432  }
  0x13   :  { %48 = vst [vmem:[#allocation2 + $0x1c] sm:$0xff] %v3615_v1  ;;  %49 = vst [vmem:[#allocation2 + $0x24] sm:$0xf] %v3615_v1  ;;  %v3378_v6 = vld [vmem:[#allocation4 + $0x94] ss:$12 sps:$4 sm:$0xff]   ;;  %1953 = vmatpush1.bf16.msra.mxu1 %v3377_v5  ;;  %vm372_vm4 = vcmask 1046532  }
  0x14   :  { %50 = vst [vmem:[#allocation2 + $0x28] sm:$0xff] %v3615_v1  ;;  %51 = vst [vmem:[#allocation2 + $0x30] sm:$0xff] %v3615_v1  ;;  %v3380_v7 = vld [vmem:[#allocation4 + $0x214] ss:$12 sps:$4 sm:$0xff]   ;;  %v3382_v8 = vld [vmem:[#allocation4 + $0x90] ss:$12 sps:$4 sm:$0xff]   ;;  %1841 = vmatprep.subr.bf16.mxu0 %v3378_v6 }
  0x15   :  { %52 = vst [vmem:[#allocation2 + $0x38] sm:$0xf] %v3615_v1  ;;  %53 = vst [vmem:[#allocation2 + $0x3c] sm:$0xff] %v3615_v1  ;;  %v3383_v9 = vld [vmem:[#allocation4 + $0x210] ss:$12 sps:$4 sm:$0xff]   ;;  %1954 = vmatprep.subr.bf16.mxu1 %v3380_v7  ;;  %vm452_vm10 = vcmask 256000  }
  0x16   :  { %54 = vst [vmem:[#allocation2 + $0x44] sm:$0xff] %v3615_v1  ;;  %55 = vst [vmem:[#allocation2 + $0x4c] sm:$0xf] %v3615_v1  ;;  %v3384_v10 = vld [vmem:[#allocation4 + $0x7c] ss:$12 sps:$4 sm:$0xff]   ;;  %1842 = vmatpush1.bf16.msra.mxu0 %v3382_v8  ;;  %vm700_vm11 = vcmask 1041408  }
  0x17   :  { %56 = vst [vmem:[#allocation2 + $0x50] sm:$0xff] %v3615_v1  ;;  %57 = vst [vmem:[#allocation2 + $0x58] sm:$0xff] %v3615_v1  ;;  %v3386_v11 = vld [vmem:[#allocation4 + $0x1fc] ss:$12 sps:$4 sm:$0xff]   ;;  %v3388_v12 = vld [vmem:[#allocation4 + $0x78] ss:$12 sps:$4 sm:$0xff]   ;;  %1955 = vmatpush1.bf16.msra.mxu1 %v3383_v9  ;;  %1843 = vmatprep.subr.bf16.mxu0 %v3384_v10 }
  0x18   :  { %58 = vst [vmem:[#allocation2 + $0x60] sm:$0xf] %v3615_v1  ;;  %59 = vst [vmem:[#allocation2 + $0x64] sm:$0xff] %v3615_v1  ;;  %v3389_v13 = vld [vmem:[#allocation4 + $0x1f8] ss:$12 sps:$4 sm:$0xff]   ;;  %1956 = vmatprep.subr.bf16.mxu1 %v3386_v11  ;;  %vm701_vm14 = vcmask 1045508  }
  0x19   :  { %60 = vst [vmem:[#allocation2 + $0x6c] sm:$0xff] %v3615_v1  ;;  %61 = vst [vmem:[#allocation2 + $0x74] sm:$0xf] %v3615_v1  ;;  %v3390_v14 = vld [vmem:[#allocation4 + $0x64] ss:$12 sps:$4 sm:$0xff]  }
  0x1a   :  { %62 = vst [vmem:[#allocation2 + $0x78] sm:$0xff] %v3615_v1  ;;  %63 = vst [vmem:[#allocation2 + $0x80] sm:$0xff] %v3615_v1  ;;  %v3392_v15 = vld [vmem:[#allocation4 + $0x1e4] ss:$12 sps:$4 sm:$0xff]   ;;  %v3394_v16 = vld [vmem:[#allocation4 + $0x60] ss:$12 sps:$4 sm:$0xff]   ;;  %1844 = vmatpush1.bf16.msra.mxu0 %v3388_v12 }
  0x1b   :  { %64 = vst [vmem:[#allocation2 + $0x88] sm:$0xf] %v3615_v1  ;;  %65 = vst [vmem:[#allocation2 + $0x8c] sm:$0xff] %v3615_v1  ;;  %1957 = vmatpush1.bf16.msra.mxu1 %v3389_v13  ;;  %v3395_v17 = vld [vmem:[#allocation4 + $0x1e0] ss:$12 sps:$4 sm:$0xff]   ;;  %1845 = vmatprep.subr.bf16.mxu0 %v3390_v14 }
  0x1c   :  { %66 = vst [vmem:[#allocation2 + $0x94] sm:$0xff] %v3615_v1  ;;  %67 = vst [vmem:[#allocation2 + $0x9c] sm:$0xf] %v3615_v1  ;;  %v3396_v18 = vld [vmem:[#allocation4 + $0x4c] ss:$12 sps:$4 sm:$0xff]   ;;  %1958 = vmatprep.subr.bf16.mxu1 %v3392_v15 }
  0x1d   :  { %68 = vst [vmem:[#allocation2 + $0xa0] sm:$0xff] %v3615_v1  ;;  %69 = vst [vmem:[#allocation2 + $0xa8] sm:$0xff] %v3615_v1  ;;  %v3398_v19 = vld [vmem:[#allocation4 + $0x1cc] ss:$12 sps:$4 sm:$0xff]   ;;  %v3400_v20 = vld [vmem:[#allocation4 + $0x48] ss:$12 sps:$4 sm:$0xff]  }
  0x1e   :  { %70 = vst [vmem:[#allocation2 + $0xb0] sm:$0xf] %v3615_v1  ;;  %71 = vst [vmem:[#allocation2 + $0xb4] sm:$0xff] %v3615_v1  ;;  %v3401_v21 = vld [vmem:[#allocation4 + $0x1c8] ss:$12 sps:$4 sm:$0xff]   ;;  %1846 = vmatpush1.bf16.msra.mxu0 %v3394_v16 }
  0x1f   :  { %72 = vst [vmem:[#allocation2 + $0xbc] sm:$0xff] %v3615_v1  ;;  %73 = vst [vmem:[#allocation2 + $0xc4] sm:$0xf] %v3615_v1  ;;  %1959 = vmatpush1.bf16.msra.mxu1 %v3395_v17  ;;  %v3402_v22 = vld [vmem:[#allocation4 + $0x34] ss:$12 sps:$4 sm:$0xff]   ;;  %1847 = vmatprep.subr.bf16.mxu0 %v3396_v18 }
  0x20   :  { %74 = vst [vmem:[#allocation2 + $0xc8] sm:$0xff] %v3615_v1  ;;  %75 = vst [vmem:[#allocation2 + $0xd0] sm:$0xff] %v3615_v1  ;;  %1960 = vmatprep.subr.bf16.mxu1 %v3398_v19  ;;  %v3404_v23 = vld [vmem:[#allocation4 + $0x1b4] ss:$12 sps:$4 sm:$0xff]   ;;  %v3406_v24 = vld [vmem:[#allocation4 + $0x30] ss:$12 sps:$4 sm:$0xff]  }
  0x21   :  { %76 = vst [vmem:[#allocation2 + $0xd8] sm:$0xf] %v3615_v1  ;;  %77 = vst [vmem:[#allocation2 + $0xdc] sm:$0xff] %v3615_v1  ;;  %v3407_v25 = vld [vmem:[#allocation4 + $0x1b0] ss:$12 sps:$4 sm:$0xff]  }
  0x22   :  { %78 = vst [vmem:[#allocation2 + $0xe4] sm:$0xff] %v3615_v1  ;;  %79 = vst [vmem:[#allocation2 + $0xec] sm:$0xf] %v3615_v1  ;;  %1848 = vmatpush1.bf16.msra.mxu0 %v3400_v20  ;;  %v3408_v26 = vld [vmem:[#allocation4 + $0x1c] ss:$12 sps:$4 sm:$0xff]  }
  0x23   :  { %80 = vst [vmem:[#allocation2 + $0xf0] sm:$0xff] %v3615_v1  ;;  %81 = vst [vmem:[#allocation2 + $0xf8] sm:$0xff] %v3615_v1  ;;  %1961 = vmatpush1.bf16.msra.mxu1 %v3401_v21  ;;  %1849 = vmatprep.subr.bf16.mxu0 %v3402_v22  ;;  %v3410_v27 = vld [vmem:[#allocation4 + $0x19c] ss:$12 sps:$4 sm:$0xff]   ;;  %v3412_v28 = vld [vmem:[#allocation4 + $0x18] ss:$12 sps:$4 sm:$0xff]  }
  0x24   :  { %82 = vst [vmem:[#allocation2 + $0x100] sm:$0xf] %v3615_v1  ;;  %83 = vst [vmem:[#allocation2 + $0x104] sm:$0xff] %v3615_v1  ;;  %1962 = vmatprep.subr.bf16.mxu1 %v3404_v23  ;;  %v3413_v29 = vld [vmem:[#allocation4 + $0x198] ss:$12 sps:$4 sm:$0xff]  }
  0x25   :  { %84 = vst [vmem:[#allocation2 + $0x10c] sm:$0xff] %v3615_v1  ;;  %85 = vst [vmem:[#allocation2 + $0x114] sm:$0xf] %v3615_v1  ;;  %v3414_v30 = vld [vmem:[#allocation4 + $0x4] ss:$12 sps:$4 sm:$0xff]  }
  0x26   :  { %86 = vst [vmem:[#allocation2 + $0x118] sm:$0xff] %v3615_v1  ;;  %87 = vst [vmem:[#allocation2 + $0x120] sm:$0xff] %v3615_v1  ;;  %1850 = vmatpush1.bf16.msra.mxu0 %v3406_v24  ;;  %v3416_v31 = vld [vmem:[#allocation4 + $0x184] ss:$12 sps:$4 sm:$0xff]   ;;  %v3418_v32 = vld [vmem:[#allocation4] ss:$12 sps:$4 sm:$0xff]  }
  0x27   :  { %88 = vst [vmem:[#allocation2 + $0x128] sm:$0xf] %v3615_v1  ;;  %89 = vst [vmem:[#allocation2 + $0x12c] sm:$0xff] %v3615_v1  ;;  %1963 = vmatpush1.bf16.msra.mxu1 %v3407_v25  ;;  %1851 = vmatprep.subr.bf16.mxu0 %v3408_v26  ;;  %v3419_v33 = vld [vmem:[#allocation4 + $0x180] ss:$12 sps:$4 sm:$0xff]  }
  0x28   :  { %90 = vst [vmem:[#allocation2 + $0x134] sm:$0xff] %v3615_v1  ;;  %91 = vst [vmem:[#allocation2 + $0x13c] sm:$0xf] %v3615_v1  ;;  %1964 = vmatprep.subr.bf16.mxu1 %v3410_v27  ;;  %v3420_v34 = vld [vmem:[#allocation4 + $0x16c] ss:$12 sps:$4 sm:$0xff]  }
  0x29   :  { %v3422_v35 = vld [vmem:[#allocation4 + $0x2ec] ss:$12 sps:$4 sm:$0xff]   ;;  %v3424_v36 = vld [vmem:[#allocation4 + $0x168] ss:$12 sps:$4 sm:$0xff]   ;;  %v3430_v40 = vld [vmem:[#allocation4 + $0x150] ss:$12 sps:$4 sm:$0xff]  }
  0x2a   :  { %1852 = vmatpush1.bf16.msra.mxu0 %v3412_v28  ;;  %v3425_v37 = vld [vmem:[#allocation4 + $0x2e8] ss:$12 sps:$4 sm:$0xff]   ;;  %v3431_v41 = vld [vmem:[#allocation4 + $0x2d0] ss:$12 sps:$4 sm:$0xff]   ;;  %v3436_v44 = vld [vmem:[#allocation4 + $0x138] ss:$12 sps:$4 sm:$0xff]  }
  0x2b   :  { %1965 = vmatpush1.bf16.msra.mxu1 %v3413_v29  ;;  %1853 = vmatprep.subr.bf16.mxu0 %v3414_v30  ;;  %v3426_v38 = vld [vmem:[#allocation4 + $0x154] ss:$12 sps:$4 sm:$0xff]   ;;  %v3432_v42 = vld [vmem:[#allocation4 + $0x13c] ss:$12 sps:$4 sm:$0xff]   ;;  %v3437_v45 = vld [vmem:[#allocation4 + $0x2b8] ss:$12 sps:$4 sm:$0xff]  }
  0x2c   :  { %1966 = vmatprep.subr.bf16.mxu1 %v3416_v31  ;;  %v3428_v39 = vld [vmem:[#allocation4 + $0x2d4] ss:$12 sps:$4 sm:$0xff]   ;;  %v3434_v43 = vld [vmem:[#allocation4 + $0x2bc] ss:$12 sps:$4 sm:$0xff]   ;;  %vm141_vm1 = vsmask.f32 3328  ;;  %vm3736_vm7 = vmor %vm371_vm3, %vm372_vm4 }
  0x2d   :  { %v3438_v46 = vld [vmem:[#allocation4 + $0x124] ss:$12 sps:$4 sm:$0xff]   ;;  %vm142_vm2 = vsmask.f32 7440  ;;  %v3442_v48 = vld [vmem:[#allocation4 + $0x120] ss:$12 sps:$4 sm:$0xff]   ;;  %vm4169_vm12 = vmand %vm108_vm0, %vm141_vm1 }
  0x2e   :  { %1854 = vmatpush1.bf16.msra.mxu0 %v3418_v32  ;;  %v3440_v47 = vld [vmem:[#allocation4 + $0x2a4] ss:$12 sps:$4 sm:$0xff]   ;;  %v3443_v49 = vld [vmem:[#allocation4 + $0x2a0] ss:$12 sps:$4 sm:$0xff]   ;;  %vm470_vm5 = vsmask.f32 2304  ;;  %vm3745_vm8 = vmor %vm141_vm1, %vm142_vm2 }
  0x2f   :  { %1967 = vmatpush1.bf16.msra.mxu1 %v3419_v33  ;;  %1855 = vmatprep.subr.bf16.mxu0 %v3420_v34  ;;  %v92_v50 = vld [vmem:[%s4871_s0] sm:$0xf]  ;;  %v3444_v51 = vld [vmem:[#allocation4 + $0x10c] ss:$12 sps:$4 sm:$0xff]   ;;  %v93_v53 = vld [vmem:[%s4871_s0 + $0x4] sm:$0xf] }
  0x30   :  { %1968 = vmatprep.subr.bf16.mxu1 %v3422_v35  ;;  %v3446_v52 = vld [vmem:[#allocation4 + $0x28c] ss:$12 sps:$4 sm:$0xff]   ;;  %109 = vst.msk [vmem:[#allocation2] sm:$0xf] %vm108_vm0, %v92_v50  ;;  %v125_v54 = vld [vmem:[%s4871_s0] sm:$0xf]  ;;  %vm4180_vm13 = vmand %vm452_vm10, %vm470_vm5 }
  0x31   :  { %v126_v55 = vld [vmem:[%s4871_s0 + $0x4] sm:$0xf]  ;;  %vm471_vm6 = vsmask.f32 6416  ;;  %110 = vst.msk [vmem:[#allocation2 + $0x14] sm:$0xf] %vm108_vm0, %v93_v53  ;;  %vm4197_vm15 = vmor %vm700_vm11, %vm701_vm14 }
  0x32   :  { %1856 = vmatpush2.bf16.msra.mxu0 %v3424_v36  ;;  %v127_v56 = vld [vmem:[%s4871_s0 + $0x8] sm:$0xf]  ;;  %v145_v57 = vshrl.u32 %v125_v54, 16  ;;  %v148_v58 = vshll.u32 %v125_v54, 16  ;;  %v154_v59 = vshll.u32 %v126_v55, 16  ;;  %v158_v60 = vshrl.u32 %v126_v55, 16  ;;  %vm3787_vm9 = vmor %vm470_vm5, %vm471_vm6 }
  0x33   :  { %1969 = vmatpush2.bf16.msra.mxu1 %v3425_v37  ;;  %1857 = vmatprep.subr.bf16.mxu0 %v3426_v38  ;;  %v164_v61 = vshll.u32 %v127_v56, 16  ;;  %v168_v62 = vshrl.u32 %v127_v56, 16  ;;  %v339_v63 = vld [vmem:[%s4871_s0] sm:$0xe]  ;;  %v340_v0 = vld [vmem:[%s4871_s0 + $0x4] sm:$0xf] }
  0x34   :  { %1970 = vmatprep.subr.bf16.mxu1 %v3428_v39  ;;  %v3448_v2 = vld [vmem:[#allocation4 + $0x108] ss:$12 sps:$4 sm:$0xff]   ;;  %v147_v4 = vrot.slane %v145_v57, 4  ;;  %v150_v5 = vrot.slane %v148_v58, 5  ;;  %v156_v6 = vrot.slane %v154_v59, 5  ;;  %v160_v7 = vrot.slane %v158_v60, 4 }
  0x35   :  { %v3449_v3 = vld [vmem:[#allocation4 + $0x288] ss:$12 sps:$4 sm:$0xff]   ;;  %v166_v11 = vrot.slane %v164_v61, 5  ;;  %v170_v12 = vrot.slane %v168_v62, 4  ;;  %v3020_v13 = vrot.slane %v339_v63, 9  ;;  %v376_v14 = vrot.slane %v340_v0, 5 }
  0x36   :  { %1858 = vmatpush2.bf16.msra.mxu0 %v3430_v40  ;;  %v341_v8 = vld [vmem:[%s4871_s0 + $0x8] sm:$0xf]  ;;  %v3450_v10 = vld [vmem:[#allocation4 + $0xf4] ss:$12 sps:$4 sm:$0xff]   ;;  %v151_v18 = vor.u32 %v150_v5, %v147_v4  ;;  %v161_v19 = vor.u32 %v160_v7, %v156_v6  ;;  %v3454_v28 = vld [vmem:[#allocation4 + $0xf0] ss:$12 sps:$4 sm:$0xff]  }
  0x37   :  { %1971 = vmatpush2.bf16.msra.mxu1 %v3431_v41  ;;  %1859 = vmatprep.subr.bf16.mxu0 %v3432_v42  ;;  %v454_v15 = vld [vmem:[%s4871_s0] sm:$0xe]  ;;  %v379_v20 = vrot.slane %v341_v8, 5  ;;  %v455_v21 = vld [vmem:[%s4871_s0 + $0x4] sm:$0xf]  ;;  %v171_v23 = vor.u32 %v170_v12, %v166_v11  ;;  %v377_v24 = vsel %vm3736_vm7, %v3020_v13, %v376_v14  ;;  %v378_v25 = vrot.slane %v376_v14, 4 }
  0x38   :  { %1972 = vmatprep.subr.bf16.mxu1 %v3434_v43  ;;  %v3452_v16 = vld [vmem:[#allocation4 + $0x274] ss:$12 sps:$4 sm:$0xff]   ;;  %v474_v22 = vshrl.u32 %v454_v15, 16  ;;  %v456_v26 = vld [vmem:[%s4871_s0 + $0x8] sm:$0xf]  ;;  %v477_v27 = vshll.u32 %v454_v15, 16 }
  0x39   :  { %v3455_v29 = vld [vmem:[#allocation4 + $0x270] ss:$12 sps:$4 sm:$0xff]   ;;  %v152_v30 = vrot.slane %v151_v18, 4  ;;  %v162_v31 = vrot.slane %v161_v19, 4  ;;  %v3757_v32 = vrot.slane %v379_v20, 4  ;;  %v380_v36 = vsel %vm3736_vm7, %v378_v25, %v379_v20 }
  0x3a   :  { %1860 = vmatpush2.bf16.msra.mxu0 %v3436_v44  ;;  %437 = vst.msk [vmem:[#allocation2 + $0x8] sm:$0xf] %vm108_vm0, %v377_v24  ;;  %v476_v33 = vrot.slane %v474_v22, 5  ;;  %v3456_v34 = vld [vmem:[#allocation4 + $0xdc] ss:$12 sps:$4 sm:$0xff]   ;;  %v479_v37 = vrot.slane %v477_v27, 6 }
  0x3b   :  { %1973 = vmatpush2.bf16.msra.mxu1 %v3437_v45  ;;  %1861 = vmatprep.subr.bf16.mxu0 %v3438_v46  ;;  %v3458_v35 = vld [vmem:[#allocation4 + $0x25c] ss:$12 sps:$4 sm:$0xff]   ;;  %v483_v38 = vshrl.u32 %v455_v21, 16  ;;  %v486_v39 = vshll.u32 %v455_v21, 16  ;;  %v157_v41 = vsel %vm3745_vm8, %v152_v30, %v156_v6  ;;  %v167_v42 = vsel %vm3745_vm8, %v162_v31, %v166_v11  ;;  %438 = vst.msk [vmem:[#allocation2 + $0x1c] sm:$0xf] %vm108_vm0, %v380_v36 }
  0x3c   :  { %1974 = vmatprep.subr.bf16.mxu1 %v3440_v47  ;;  %v94_v40 = vld [vmem:[%s4871_s0 + $0x8] sm:$0xf]  ;;  %v493_v43 = vshrl.u32 %v456_v26, 16  ;;  %v496_v44 = vshll.u32 %v456_v26, 16  ;;  %v95_v45 = vld [vmem:[%s4871_s0 + $0xc] sm:$0xf]  ;;  %v480_v47 = vor.u32 %v479_v37, %v476_v33 }
  0x3d   :  { %111 = vst.msk [vmem:[#allocation2 + $0x28] sm:$0xf] %vm108_vm0, %v94_v40  ;;  %v128_v46 = vld [vmem:[%s4871_s0 + $0xc] sm:$0xf]  ;;  %319 = vst.msk [vmem:[#allocation2 + $0x4] sm:$0xf] %vm108_vm0, %v157_v41 }
  0x3e   :  { %1862 = vmatpush2.bf16.msra.mxu0 %v3442_v48  ;;  %320 = vst.msk [vmem:[#allocation2 + $0x18] sm:$0xf] %vm108_vm0, %v167_v42  ;;  %v485_v48 = vrot.slane %v483_v38, 5  ;;  %112 = vst.msk [vmem:[#allocation2 + $0x3c] sm:$0xf] %vm108_vm0, %v95_v45  ;;  %v495_v55 = vrot.slane %v493_v43, 5 }
  0x3f   :  { %1975 = vmatpush2.bf16.msra.mxu1 %v3443_v49  ;;  %1863 = vmatprep.subr.bf16.mxu0 %v3444_v51  ;;  %v488_v49 = vrot.slane %v486_v39, 6  ;;  %v3783_v50 = vld [vmem:[%s4871_s0 + $0x10] sm:$0xf]  ;;  %v172_v51 = vrot.slane %v171_v23, 4  ;;  %v3461_v53 = vld [vmem:[#allocation4 + $0x258] ss:$12 sps:$4 sm:$0xff]  }
  0x40   :  { %1976 = vmatprep.subr.bf16.mxu1 %v3446_v52  ;;  %v3460_v52 = vld [vmem:[#allocation4 + $0xd8] ss:$12 sps:$4 sm:$0xff]   ;;  %v498_v56 = vrot.slane %v496_v44, 6  ;;  %v174_v57 = vshll.u32 %v128_v46, 16  ;;  %v178_v58 = vshrl.u32 %v128_v46, 16  ;;  %v481_v62 = vrot.slane %v480_v47, 4 }
  0x41   :  { %v342_v59 = vld [vmem:[%s4871_s0 + $0xc] sm:$0xf]  ;;  %v3462_v60 = vld [vmem:[#allocation4 + $0xc4] ss:$12 sps:$4 sm:$0xff]   ;;  %v489_v63 = vor.u32 %v488_v49, %v485_v48  ;;  %v184_v0 = vshll.u32 %v3783_v50, 16  ;;  %v188_v11 = vshrl.u32 %v3783_v50, 16 }
  0x42   :  { %1864 = vmatpush2.bf16.msra.mxu0 %v3448_v2  ;;  %v3464_v61 = vld [vmem:[#allocation4 + $0x244] ss:$12 sps:$4 sm:$0xff]   ;;  %v176_v4 = vrot.slane %v174_v57, 5  ;;  %v180_v5 = vrot.slane %v178_v58, 4  ;;  %v382_v6 = vrot.slane %v342_v59, 5  ;;  %vm781_vm1 = vcmask 254976  }
  0x43   :  { %1977 = vmatpush2.bf16.msra.mxu1 %v3449_v3  ;;  %1865 = vmatprep.subr.bf16.mxu0 %v3450_v10  ;;  %v3798_v2 = vld [vmem:[%s4871_s0 + $0x10] sm:$0xf]  ;;  %v3800_v3 = vor.u32 %v498_v56, %v495_v55  ;;  %v457_v7 = vld [vmem:[%s4871_s0 + $0xc] sm:$0xf]  ;;  %v490_v8 = vsel %vm3787_vm9, %v481_v62, %v489_v63  ;;  %v491_v10 = vrot.slane %v489_v63, 4  ;;  %v186_v19 = vrot.slane %v184_v0, 5 }
  0x44   :  { %1978 = vmatprep.subr.bf16.mxu1 %v3452_v16  ;;  %v385_v12 = vrot.slane %v3798_v2, 5  ;;  %v458_v13 = vld [vmem:[%s4871_s0 + $0x10] sm:$0xf]  ;;  %648 = vst.msk [vmem:[#allocation2 + $0xc] sm:$0xf] %vm108_vm0, %v490_v8  ;;  %v177_v16 = vsel %vm3745_vm8, %v172_v51, %v176_v4  ;;  %v181_v18 = vor.u32 %v180_v5, %v176_v4  ;;  %v383_v20 = vsel %vm3736_vm7, %v3757_v32, %v382_v6 }
  0x45   :  { %v3466_v14 = vld [vmem:[#allocation4 + $0xc0] ss:$12 sps:$4 sm:$0xff]   ;;  %v500_v21 = vsel %vm3787_vm9, %v491_v10, %v3800_v3  ;;  %321 = vst.msk [vmem:[#allocation2 + $0x2c] sm:$0xf] %vm108_vm0, %v177_v16  ;;  %v384_v23 = vrot.slane %v382_v6, 4  ;;  %v503_v24 = vshrl.u32 %v457_v7, 16 }
  0x46   :  { %1866 = vmatpush2.bf16.msra.mxu0 %v3454_v28  ;;  %v3467_v15 = vld [vmem:[#allocation4 + $0x240] ss:$12 sps:$4 sm:$0xff]   ;;  %439 = vst.msk [vmem:[#allocation2 + $0x30] sm:$0xf] %vm108_vm0, %v383_v20  ;;  %v506_v25 = vshll.u32 %v457_v7, 16  ;;  %v501_v27 = vrot.slane %v3800_v3, 4 }
  0x47   :  { %1979 = vmatpush2.bf16.msra.mxu1 %v3455_v29  ;;  %1867 = vmatprep.subr.bf16.mxu0 %v3456_v34  ;;  %v3476_v22 = vld [vmem:[#allocation4 + $0x3ac] ss:$12 sps:$4 sm:$0xff]   ;;  %649 = vst.msk [vmem:[#allocation2 + $0x20] sm:$0xf] %vm108_vm0, %v500_v21  ;;  %v182_v28 = vrot.slane %v181_v18, 4  ;;  %v513_v29 = vshrl.u32 %v458_v13, 16  ;;  %v386_v32 = vsel %vm3736_vm7, %v384_v23, %v385_v12 }
  0x48   :  { %1980 = vmatprep.subr.bf16.mxu1 %v3458_v35  ;;  %v96_v26 = vld [vmem:[%s4871_s0 + $0x10] sm:$0xf]  ;;  %v3468_v30 = vld [vmem:[#allocation2] ss:$20 sps:$4 sm:$0xff]   ;;  %v3470_v31 = vld [vmem:[#allocation2 + $0x4] ss:$20 sps:$4 sm:$0xff]  }
  0x49   :  { %113 = vst.msk [vmem:[#allocation2 + $0x50] sm:$0xf] %vm108_vm0, %v96_v26  ;;  %v505_v33 = vrot.slane %v503_v24, 5  ;;  %v508_v34 = vrot.slane %v506_v25, 6  ;;  %v516_v35 = vshll.u32 %v458_v13, 16  ;;  %v187_v37 = vsel %vm3745_vm8, %v182_v28, %v186_v19  ;;  %1871 = vmatprep.mubr.bf16.mxu0 %v3470_v31 }
  0x4a   :  { %1868 = vmatpush2.bf16.msra.mxu0 %v3460_v52  ;;  %v3474_v36 = vld [vmem:[#allocation4 + $0x3a8] ss:$12 sps:$4 sm:$0xff]   ;;  %440 = vst.msk [vmem:[#allocation2 + $0x44] sm:$0xf] %vm108_vm0, %v386_v32  ;;  %v515_v38 = vrot.slane %v513_v29, 5  ;;  %v190_v41 = vrot.slane %v188_v11, 4 }
  0x4b   :  { %1981 = vmatpush2.bf16.msra.mxu1 %v3461_v53  ;;  %1869 = vmatprep.subr.bf16.mxu0 %v3462_v60  ;;  %v97_v39 = vld [vmem:[%s4871_s0 + $0x14] sm:$0xf]  ;;  %322 = vst.msk [vmem:[#allocation2 + $0x40] sm:$0xf] %vm108_vm0, %v187_v37  ;;  %v509_v42 = vor.u32 %v508_v34, %v505_v33  ;;  %v518_v43 = vrot.slane %v516_v35, 6  ;;  %v387_v63 = vrot.slane %v385_v12, 4 }
  0x4c   :  { %1982 = vmatprep.subr.bf16.mxu1 %v3464_v61  ;;  %v130_v40 = vld [vmem:[%s4871_s0 + $0x14] sm:$0xf]  ;;  %114 = vst.msk [vmem:[#allocation2 + $0x64] sm:$0xf] %vm108_vm0, %v97_v39  ;;  %v3847_v45 = vld [vmem:[%s4871_s0 + $0x18] sm:$0xf]  ;;  %v191_v48 = vor.u32 %v190_v41, %v186_v19 }
  0x4d   :  { %v3484_v44 = vld [vmem:[#allocation4 + $0x394] ss:$12 sps:$4 sm:$0xff]   ;;  %v194_v46 = vshll.u32 %v130_v40, 16  ;;  %v198_v47 = vshrl.u32 %v130_v40, 16  ;;  %v204_v49 = vshll.u32 %v3847_v45, 16  ;;  %v208_v50 = vshrl.u32 %v3847_v45, 16 }
  0x4e   :  { %1870 = vmatpush2.bf16.msra.mxu0 %v3466_v14  ;;  %v344_v51 = vld [vmem:[%s4871_s0 + $0x14] sm:$0xf]  ;;  %v3857_v52 = vld [vmem:[%s4871_s0 + $0x18] sm:$0xf]  ;;  %v510_v53 = vsel %vm3787_vm9, %v501_v27, %v509_v42  ;;  %v511_v55 = vrot.slane %v509_v42, 4  ;;  %v3861_v56 = vor.u32 %v518_v43, %v515_v38  ;;  %v192_v60 = vrot.slane %v191_v48, 4 }
  0x4f   :  { %1983 = vmatpush2.bf16.msra.mxu1 %v3467_v15  ;;  %2065 = vmatprep.subr.bf16.mxu0 %v3476_v22  ;;  %v196_v57 = vrot.slane %v194_v46, 5  ;;  %v459_v58 = vld [vmem:[%s4871_s0 + $0x14] sm:$0xf]  ;;  %650 = vst.msk [vmem:[#allocation2 + $0x34] sm:$0xf] %vm108_vm0, %v510_v53  ;;  %v200_v61 = vrot.slane %v198_v47, 4 }
  0x50   :  { %v3482_v59 = vld [vmem:[#allocation4 + $0x390] ss:$12 sps:$4 sm:$0xff]   ;;  %v3867_v62 = vrot.slane %v204_v49, 5  ;;  %v520_v4 = vsel %vm3787_vm9, %v511_v55, %v3861_v56  ;;  %v388_v5 = vrot.slane %v344_v51, 5  ;;  %v789_v6 = vld [vmem:[#allocation2 + $0x28] sm:$0xff]  ;;  %v391_v10 = vrot.slane %v3857_v52, 5 }
  0x51   :  { %v3471_v0 = vld [vmem:[#allocation2 + $0x8] ss:$20 sps:$4 sm:$0xff]   ;;  %v3473_v3 = vld [vmem:[#allocation2 + $0xc] ss:$20 sps:$4 sm:$0xff]   ;;  %1872 = vmatmul.mubr.bf16.vlgmr.msra.gmra.mxu0 %v3468_v30  ;;  %651 = vst.msk [vmem:[#allocation2 + $0x48] sm:$0xf] %vm108_vm0, %v520_v4  ;;  %v197_v7 = vsel %vm3745_vm8, %v192_v60, %v196_v57  ;;  %v201_v8 = vor.u32 %v200_v61, %v196_v57 }
  0x52   :  { %2066 = vmatpush1.bf16.msra.mxu0 %v3474_v36  ;;  %v460_v2 = vld [vmem:[%s4871_s0 + $0x18] sm:$0xf]  ;;  %v521_v11 = vrot.slane %v3861_v56, 4  ;;  %1984 = vmatprep.mubr.bf16.mxu1 %v3473_v3  ;;  %323 = vst.msk [vmem:[#allocation2 + $0x54] sm:$0xf] %vm108_vm0, %v197_v7  ;;  %v389_v12 = vsel %vm3736_vm7, %v387_v63, %v388_v5  ;;  %v390_v13 = vrot.slane %v388_v5, 4 }
  0x53   :  { %2067 = vmatprep.subr.bf16.mxu0 %v3484_v44  ;;  %v523_v14 = vshrl.u32 %v459_v58, 16  ;;  %v526_v15 = vshll.u32 %v459_v58, 16  ;;  %v3492_v16 = vld [vmem:[#allocation4 + $0x37c] ss:$12 sps:$4 sm:$0xff]   ;;  %1985 = vmatmul.mubr.bf16.vlgmr.msra.gmra.mxu1 %v3471_v0  ;;  %v202_v20 = vrot.slane %v201_v8, 4  ;;  %v533_v21 = vshrl.u32 %v460_v2, 16 }
  0x54   :  { %v792_v18 = vld [vmem:[#allocation2 + $0x3c] sm:$0xff]  ;;  %441 = vst.msk [vmem:[#allocation2 + $0x58] sm:$0xf] %vm108_vm0, %v389_v12  ;;  %v536_v22 = vshll.u32 %v460_v2, 16  ;;  %v392_v25 = vsel %vm3736_vm7, %v390_v13, %v391_v10  ;;  %v98_v28 = vld [vmem:[%s4871_s0 + $0x18] sm:$0xf] }
  0x55   :  { %v3477_v19 = vld [vmem:[#allocation2 + $0x2c] ss:$20 sps:$4 sm:$0xff]   ;;  %v3490_v23 = vld [vmem:[#allocation4 + $0x378] ss:$12 sps:$4 sm:$0xff]   ;;  %v3886_v24 = vcombine.low %v789_v6, %v792_v18  ;;  %v525_v26 = vrot.slane %v523_v14, 5  ;;  %v528_v27 = vrot.slane %v526_v15, 6  ;;  %v207_v30 = vsel %vm3745_vm8, %v202_v20, %v3867_v62 }
  0x56   :  { %v99_v29 = vld [vmem:[%s4871_s0 + $0x1c] sm:$0xf]  ;;  %1881 = vmatprep.mubr.bf16.mxu0 %v3477_v19  ;;  %2068 = vmatpush1.bf16.msra.mxu0 %v3482_v59  ;;  %442 = vst.msk [vmem:[#allocation2 + $0x6c] sm:$0xf] %vm108_vm0, %v392_v25  ;;  %v535_v31 = vrot.slane %v533_v21, 5  ;;  %v538_v32 = vrot.slane %v536_v22, 6 }
  0x57   :  { %115 = vst.msk [vmem:[#allocation2 + $0x78] sm:$0xf] %vm108_vm0, %v98_v28  ;;  %116 = vst.msk [vmem:[#allocation2 + $0x8c] sm:$0xf] %vm108_vm0, %v99_v29  ;;  %v132_v33 = vld [vmem:[%s4871_s0 + $0x1c] sm:$0xf]  ;;  %v529_v35 = vor.u32 %v528_v27, %v525_v26  ;;  %2069 = vmatprep.subr.bf16.mxu0 %v3492_v16 }
  0x58   :  { %v133_v34 = vld [vmem:[%s4871_s0 + $0x20] sm:$0xf]  ;;  %324 = vst.msk [vmem:[#allocation2 + $0x68] sm:$0xf] %vm108_vm0, %v207_v30  ;;  %v210_v36 = vrot.slane %v208_v50, 4  ;;  %v214_v37 = vshll.u32 %v132_v33, 16  ;;  %v3912_v40 = vor.u32 %v538_v32, %v535_v31 }
  0x59   :  { %v218_v38 = vshrl.u32 %v132_v33, 16  ;;  %v346_v39 = vld [vmem:[%s4871_s0 + $0x1c] sm:$0xf]  ;;  %v224_v41 = vshll.u32 %v133_v34, 16  ;;  %v228_v42 = vshrl.u32 %v133_v34, 16  ;;  %v393_v44 = vrot.slane %v391_v10, 4  ;;  %1882 = vmatmul.mubr.bf16.gmra.mxu0 %v3886_v24 }
  0x5a   :  { %v347_v43 = vld [vmem:[%s4871_s0 + $0x20] sm:$0xf]  ;;  %v3479_v45 = vld [vmem:[#allocation2 + $0x34] ss:$20 sps:$4 sm:$0xff]   ;;  %v3481_v46 = vld [vmem:[#allocation2 + $0x30] ss:$20 sps:$4 sm:$0xff]   ;;  %v530_v47 = vsel %vm3787_vm9, %v521_v11, %v529_v35  ;;  %v211_v49 = vor.u32 %v210_v36, %v3867_v62  ;;  %2070 = vmatpush1.bf16.msra.mxu0 %v3490_v23 }
  0x5b   :  { %v531_v48 = vrot.slane %v529_v35, 4  ;;  %v795_v50 = vld [vmem:[#allocation2 + $0x50] sm:$0xff]  ;;  %652 = vst.msk [vmem:[#allocation2 + $0x5c] sm:$0xf] %vm108_vm0, %v530_v47  ;;  %v216_v51 = vrot.slane %v214_v37, 5  ;;  %v220_v52 = vrot.slane %v218_v38, 4  ;;  %1994 = vmatprep.mubr.bf16.mxu1 %v3479_v45 }
  0x5c   :  { %v226_v53 = vrot.slane %v224_v41, 5  ;;  %v394_v55 = vrot.slane %v346_v39, 5  ;;  %v212_v57 = vrot.slane %v211_v49, 4  ;;  %v397_v58 = vrot.slane %v347_v43, 5  ;;  %v461_v59 = vld [vmem:[%s4871_s0 + $0x1c] sm:$0xf]  ;;  %1995 = vmatmul.mubr.bf16.gmra.mxu1 %v3481_v46 }
  0x5d   :  { %v540_v56 = vsel %vm3787_vm9, %v531_v48, %v3912_v40  ;;  %v462_v60 = vld [vmem:[%s4871_s0 + $0x20] sm:$0xf]  ;;  %v221_v61 = vor.u32 %v220_v52, %v216_v51  ;;  %v541_v0 = vrot.slane %v3912_v40, 4  ;;  %v3500_v4 = vld [vmem:[#allocation4 + $0x364] ss:$12 sps:$4 sm:$0xff]   ;;  %v543_v6 = vshrl.u32 %v461_v59, 16 }
  0x5e   :  { %653 = vst.msk [vmem:[#allocation2 + $0x70] sm:$0xf] %vm108_vm0, %v540_v56  ;;  %v395_v62 = vsel %vm3736_vm7, %v393_v44, %v394_v55  ;;  %v396_v63 = vrot.slane %v394_v55, 4  ;;  %v3498_v3 = vld [vmem:[#allocation4 + $0x360] ss:$12 sps:$4 sm:$0xff]   ;;  %v217_v5 = vsel %vm3745_vm8, %v212_v57, %v216_v51  ;;  %v546_v7 = vshll.u32 %v461_v59, 16  ;;  %2071 = vmatprep.subr.bf16.mxu0 %v3500_v4 }
  0x5f   :  { %443 = vst.msk [vmem:[#allocation2 + $0x80] sm:$0xf] %vm108_vm0, %v395_v62  ;;  %v553_v8 = vshrl.u32 %v462_v60, 16  ;;  %v100_v10 = vld [vmem:[%s4871_s0 + $0x20] sm:$0xf]  ;;  %v798_v2 = vld [vmem:[#allocation2 + $0x64] sm:$0xff]  ;;  %2072 = vmatpush1.bf16.msra.mxu0 %v3498_v3 }
  0x60   :  { %v3941_v11 = vld [vmem:[#allocation2 + $0x54] ss:$20 sps:$4 sm:$0xff]   ;;  %v222_v12 = vrot.slane %v221_v61, 4  ;;  %325 = vst.msk [vmem:[#allocation2 + $0x7c] sm:$0xf] %vm108_vm0, %v217_v5  ;;  %v398_v13 = vsel %vm3736_vm7, %v396_v63, %v397_v58  ;;  %v556_v14 = vshll.u32 %v462_v60, 16  ;;  %v3947_v16 = vcombine.low %v795_v50, %v798_v2 }
  0x61   :  { %117 = vst.msk [vmem:[#allocation2 + $0xa0] sm:$0xf] %vm108_vm0, %v100_v10  ;;  %v230_v15 = vrot.slane %v228_v42, 4  ;;  %444 = vst.msk [vmem:[#allocation2 + $0x94] sm:$0xf] %vm108_vm0, %v398_v13  ;;  %v545_v18 = vrot.slane %v543_v6, 5  ;;  %1891 = vmatprep.mubr.bf16.mxu0 %v3941_v11 }
  0x62   :  { %v548_v19 = vrot.slane %v546_v7, 6  ;;  %v555_v20 = vrot.slane %v553_v8, 5  ;;  %v101_v21 = vld [vmem:[%s4871_s0 + $0x24] sm:$0xf]  ;;  %v227_v22 = vsel %vm3745_vm8, %v222_v12, %v226_v53  ;;  %v558_v23 = vrot.slane %v556_v14, 6  ;;  %1892 = vmatmul.mubr.bf16.gmra.mxu0 %v3947_v16 }
  0x63   :  { %118 = vst.msk [vmem:[#allocation2 + $0xb4] sm:$0xf] %vm108_vm0, %v101_v21  ;;  %v134_v25 = vld [vmem:[%s4871_s0 + $0x24] sm:$0xf]  ;;  %v3963_v26 = vld [vmem:[%s4871_s0 + $0x28] sm:$0xf]  ;;  %v231_v27 = vor.u32 %v230_v15, %v226_v53 }
  0x64   :  { %v399_v28 = vrot.slane %v397_v58, 4  ;;  %326 = vst.msk [vmem:[#allocation2 + $0x90] sm:$0xf] %vm108_vm0, %v227_v22  ;;  %v549_v29 = vor.u32 %v548_v19, %v545_v18  ;;  %v234_v30 = vshll.u32 %v134_v25, 16  ;;  %v238_v31 = vshrl.u32 %v134_v25, 16 }
  0x65   :  { %v244_v32 = vshll.u32 %v3963_v26, 16  ;;  %v348_v33 = vld [vmem:[%s4871_s0 + $0x24] sm:$0xf]  ;;  %v559_v34 = vor.u32 %v558_v23, %v555_v20  ;;  %v232_v35 = vrot.slane %v231_v27, 4  ;;  %v248_v36 = vshrl.u32 %v3963_v26, 16 }
  0x66   :  { %v3975_v37 = vld [vmem:[%s4871_s0 + $0x28] sm:$0xf]  ;;  %v400_v38 = vrot.slane %v348_v33, 5  ;;  %v3487_v39 = vld [vmem:[#allocation2 + $0x5c] ss:$20 sps:$4 sm:$0xff]   ;;  %v550_v41 = vsel %vm3787_vm9, %v541_v0, %v549_v29  ;;  %v551_v42 = vrot.slane %v549_v29, 4 }
  0x67   :  { %v3489_v40 = vld [vmem:[#allocation2 + $0x58] ss:$20 sps:$4 sm:$0xff]   ;;  %654 = vst.msk [vmem:[#allocation2 + $0x84] sm:$0xf] %vm108_vm0, %v550_v41  ;;  %v236_v43 = vrot.slane %v234_v30, 5  ;;  %v240_v44 = vrot.slane %v238_v31, 4  ;;  %2004 = vmatprep.mubr.bf16.mxu1 %v3487_v39 }
  0x68   :  { %v3980_v45 = vrot.slane %v244_v32, 5  ;;  %v401_v46 = vsel %vm3736_vm7, %v399_v28, %v400_v38  ;;  %v463_v47 = vld [vmem:[%s4871_s0 + $0x24] sm:$0xf]  ;;  %v801_v48 = vld [vmem:[#allocation2 + $0x78] sm:$0xff]  ;;  %v560_v49 = vsel %vm3787_vm9, %v551_v42, %v559_v34  ;;  %v402_v50 = vrot.slane %v400_v38, 4  ;;  %2005 = vmatmul.mubr.bf16.gmra.mxu1 %v3489_v40 }
  0x69   :  { %v403_v51 = vrot.slane %v3975_v37, 5  ;;  %445 = vst.msk [vmem:[#allocation2 + $0xa8] sm:$0xf] %vm108_vm0, %v401_v46  ;;  %v464_v52 = vld [vmem:[%s4871_s0 + $0x28] sm:$0xf]  ;;  %v561_v53 = vrot.slane %v559_v34, 4  ;;  %v237_v55 = vsel %vm3745_vm8, %v232_v35, %v236_v43  ;;  %v241_v56 = vor.u32 %v240_v44, %v236_v43 }
  0x6a   :  { %655 = vst.msk [vmem:[#allocation2 + $0x98] sm:$0xf] %vm108_vm0, %v560_v49  ;;  %v563_v57 = vshrl.u32 %v463_v47, 16  ;;  %v566_v58 = vshll.u32 %v463_v47, 16  ;;  %v3506_v59 = vld [vmem:[#allocation4 + $0x348] ss:$12 sps:$4 sm:$0xff]  }
  0x6b   :  { %v3508_v60 = vld [vmem:[#allocation4 + $0x34c] ss:$12 sps:$4 sm:$0xff]   ;;  %327 = vst.msk [vmem:[#allocation2 + $0xa4] sm:$0xf] %vm108_vm0, %v237_v55  ;;  %v404_v61 = vsel %vm3736_vm7, %v402_v50, %v403_v51  ;;  %v573_v62 = vshrl.u32 %v464_v52, 16  ;;  %v576_v63 = vshll.u32 %v464_v52, 16 }
  0x6c   :  { %v804_v0 = vld [vmem:[#allocation2 + $0x8c] sm:$0xff]  ;;  %v242_v4 = vrot.slane %v241_v56, 4  ;;  %446 = vst.msk [vmem:[#allocation2 + $0xbc] sm:$0xf] %vm108_vm0, %v404_v61  ;;  %v565_v5 = vrot.slane %v563_v57, 5  ;;  %v568_v6 = vrot.slane %v566_v58, 6  ;;  %2073 = vmatprep.subr.bf16.mxu0 %v3508_v60 }
  0x6d   :  { %v4002_v3 = vld [vmem:[#allocation2 + $0x7c] ss:$20 sps:$4 sm:$0xff]   ;;  %v4005_v7 = vcombine.low %v801_v48, %v804_v0  ;;  %v575_v8 = vrot.slane %v573_v62, 5  ;;  %v578_v10 = vrot.slane %v576_v63, 6  ;;  %2074 = vmatpush1.bf16.msra.mxu0 %v3506_v59  ;;  %v102_v15 = vld [vmem:[%s4871_s0 + $0x28] sm:$0xf] }
  0x6e   :  { %v3509_v2 = vld [vmem:[#allocation4 + $0x170] ss:$12 sps:$4 sm:$0xff]   ;;  %1901 = vmatprep.mubr.bf16.mxu0 %v4002_v3  ;;  %v247_v12 = vsel %vm3745_vm8, %v242_v4, %v3980_v45  ;;  %v569_v13 = vor.u32 %v568_v6, %v565_v5  ;;  %v103_v19 = vld [vmem:[%s4871_s0 + $0x2c] sm:$0xf]  ;;  %119 = vst.msk [vmem:[#allocation2 + $0xc8] sm:$0xf] %vm108_vm0, %v102_v15 }
  0x6f   :  { %v3510_v14 = vld [vmem:[#allocation4 + $0xb0] ss:$12 sps:$4 sm:$0xff]   ;;  %1902 = vmatmul.mubr.bf16.gmra.mxu0 %v4005_v7  ;;  %328 = vst.msk [vmem:[#allocation2 + $0xb8] sm:$0xf] %vm108_vm0, %v247_v12  ;;  %v4016_v18 = vor.u32 %v578_v10, %v575_v8  ;;  %3182 = vmatprep.subr.bf16.mxu1 %v3509_v2  ;;  %v136_v20 = vld [vmem:[%s4871_s0 + $0x2c] sm:$0xf] }
  0x70   :  { %v250_v21 = vrot.slane %v248_v36, 4  ;;  %v570_v22 = vsel %vm3787_vm9, %v561_v53, %v569_v13  ;;  %v571_v23 = vrot.slane %v569_v13, 4  ;;  %3183 = vmatpush3.bf16.msra.mxu1 %v3510_v14  ;;  %120 = vst.msk [vmem:[#allocation2 + $0xdc] sm:$0xf] %vm108_vm0, %v103_v19  ;;  %v137_v25 = vld [vmem:[%s4871_s0 + $0x30] sm:$0xf] }
  0x71   :  { %v254_v26 = vshll.u32 %v136_v20, 16  ;;  %v258_v27 = vshrl.u32 %v136_v20, 16  ;;  %v4031_v28 = vld [vmem:[#allocation2 + $0x84] ss:$20 sps:$4 sm:$0xff]   ;;  %v4033_v29 = vld [vmem:[#allocation2 + $0x80] ss:$20 sps:$4 sm:$0xff]  }
  0x72   :  { %656 = vst.msk [vmem:[#allocation2 + $0xac] sm:$0xf] %vm108_vm0, %v570_v22  ;;  %v251_v30 = vor.u32 %v250_v21, %v3980_v45  ;;  %v264_v31 = vshll.u32 %v137_v25, 16  ;;  %v807_v32 = vld [vmem:[#allocation2 + $0xa0] sm:$0xff]  ;;  %v580_v33 = vsel %vm3787_vm9, %v571_v23, %v4016_v18  ;;  %v268_v36 = vshrl.u32 %v137_v25, 16  ;;  %2014 = vmatprep.mubr.bf16.mxu1 %v4031_v28 }
  0x73   :  { %v256_v34 = vrot.slane %v254_v26, 5  ;;  %v260_v35 = vrot.slane %v258_v27, 4  ;;  %v350_v38 = vld [vmem:[%s4871_s0 + $0x2c] sm:$0xf]  ;;  %657 = vst.msk [vmem:[#allocation2 + $0xc0] sm:$0xf] %vm108_vm0, %v580_v33  ;;  %2015 = vmatmul.mubr.bf16.gmra.mxu1 %v4033_v29 }
  0x74   :  { %v252_v39 = vrot.slane %v251_v30, 4  ;;  %v266_v40 = vrot.slane %v264_v31, 5  ;;  %v351_v41 = vld [vmem:[%s4871_s0 + $0x30] sm:$0xf]  ;;  %v405_v42 = vrot.slane %v403_v51, 4  ;;  %v406_v43 = vrot.slane %v350_v38, 5 }
  0x75   :  { %v261_v44 = vor.u32 %v260_v35, %v256_v34  ;;  %v409_v45 = vrot.slane %v351_v41, 5  ;;  %v465_v46 = vld [vmem:[%s4871_s0 + $0x2c] sm:$0xf]  ;;  %v466_v47 = vld [vmem:[%s4871_s0 + $0x30] sm:$0xf]  ;;  %v581_v48 = vrot.slane %v4016_v18, 4 }
  0x76   :  { %v257_v49 = vsel %vm3745_vm8, %v252_v39, %v256_v34  ;;  %v407_v37 = vsel %vm3736_vm7, %v405_v42, %v406_v43  ;;  %v408_v50 = vrot.slane %v406_v43, 4  ;;  %v583_v51 = vshrl.u32 %v465_v46, 16  ;;  %v3516_v52 = vld [vmem:[#allocation4 + $0x330] ss:$12 sps:$4 sm:$0xff]   ;;  %v3518_v53 = vld [vmem:[#allocation4 + $0x334] ss:$12 sps:$4 sm:$0xff]  }
  0x77   :  { %v810_v55 = vld [vmem:[#allocation2 + $0xb4] sm:$0xff]  ;;  %v262_v57 = vrot.slane %v261_v44, 4  ;;  %329 = vst.msk [vmem:[#allocation2 + $0xcc] sm:$0xf] %vm108_vm0, %v257_v49  ;;  %447 = vst.msk [vmem:[#allocation2 + $0xd0] sm:$0xf] %vm108_vm0, %v407_v37  ;;  %2075 = vmatprep.subr.bf16.mxu0 %v3518_v53 }
  0x78   :  { %v4062_v56 = vld [vmem:[#allocation2 + $0xa4] ss:$20 sps:$4 sm:$0xff]   ;;  %v586_v58 = vshll.u32 %v465_v46, 16  ;;  %v593_v59 = vshrl.u32 %v466_v47, 16  ;;  %v4066_v60 = vcombine.low %v807_v32, %v810_v55  ;;  %v410_v61 = vsel %vm3736_vm7, %v408_v50, %v409_v45  ;;  %2076 = vmatpush1.bf16.msra.mxu0 %v3516_v52  ;;  %v4078_v12 = vld [vmem:[#allocation2 + $0xa8] ss:$20 sps:$4 sm:$0xff]  }
  0x79   :  { %v585_v62 = vrot.slane %v583_v51, 5  ;;  %v596_v63 = vshll.u32 %v466_v47, 16  ;;  %1911 = vmatprep.mubr.bf16.mxu0 %v4062_v56  ;;  %v267_v0 = vsel %vm3745_vm8, %v262_v57, %v266_v40  ;;  %448 = vst.msk [vmem:[#allocation2 + $0xe4] sm:$0xf] %vm108_vm0, %v410_v61  ;;  %v3519_v6 = vld [vmem:[#allocation4 + $0x158] ss:$12 sps:$4 sm:$0xff]  }
  0x7a   :  { %v588_v4 = vrot.slane %v586_v58, 6  ;;  %v595_v5 = vrot.slane %v593_v59, 5  ;;  %v270_v8 = vrot.slane %v268_v36, 4  ;;  %1912 = vmatmul.mubr.bf16.gmra.mxu0 %v4066_v60  ;;  %330 = vst.msk [vmem:[#allocation2 + $0xe0] sm:$0xf] %vm108_vm0, %v267_v0  ;;  %3184 = vmatprep.subr.bf16.mxu1 %v3519_v6  ;;  %v411_v22 = vrot.slane %v409_v45, 4 }
  0x7b   :  { %v598_v10 = vrot.slane %v596_v63, 6  ;;  %v4076_v2 = vld [vmem:[#allocation2 + $0xac] ss:$20 sps:$4 sm:$0xff]   ;;  %v3520_v18 = vld [vmem:[#allocation4 + $0x98] ss:$12 sps:$4 sm:$0xff]   ;;  %vm2833_vm2 = vcmask 1042434  }
  0x7c   :  { %v589_v13 = vor.u32 %v588_v4, %v585_v62  ;;  %v271_v14 = vor.u32 %v270_v8, %v266_v40  ;;  %2024 = vmatprep.mubr.bf16.mxu1 %v4076_v2  ;;  %v3521_v21 = vld [vmem:[#allocation4 + $0x140] ss:$12 sps:$4 sm:$0xff]   ;;  %3185 = vmatpush3.bf16.msra.mxu1 %v3520_v18  ;;  %v105_v31 = vld [vmem:[%s4871_s0 + $0x34] sm:$0xf]  ;;  %v139_v33 = vld [vmem:[%s4871_s0 + $0x38] sm:$0xf] }
  0x7d   :  { %v4080_v15 = vor.u32 %v598_v10, %v595_v5  ;;  %2025 = vmatmul.mubr.bf16.gmra.mxu1 %v4078_v12  ;;  %v3522_v25 = vld [vmem:[#allocation4 + $0x80] ss:$12 sps:$4 sm:$0xff]   ;;  %v138_v32 = vld [vmem:[%s4871_s0 + $0x34] sm:$0xf]  ;;  %3186 = vmatprep.subr.bf16.mxu1 %v3521_v21  ;;  %122 = vst.msk [vmem:[#allocation2 + $0x104] sm:$0xf] %vm108_vm0, %v105_v31 }
  0x7e   :  { %v590_v19 = vsel %vm3787_vm9, %v581_v48, %v589_v13  ;;  %v591_v20 = vrot.slane %v589_v13, 4  ;;  %v813_v23 = vld [vmem:[#allocation2 + $0xc8] sm:$0xff]  ;;  %v272_v26 = vrot.slane %v271_v14, 4  ;;  %v104_v30 = vld [vmem:[%s4871_s0 + $0x30] sm:$0xf]  ;;  %v274_v34 = vshll.u32 %v138_v32, 16 }
  0x7f   :  { %658 = vst.msk [vmem:[#allocation2 + $0xd4] sm:$0xf] %vm108_vm0, %v590_v19  ;;  %121 = vst.msk [vmem:[#allocation2 + $0xf0] sm:$0xf] %vm108_vm0, %v104_v30  ;;  %v278_v35 = vshrl.u32 %v138_v32, 16  ;;  %v284_v40 = vshll.u32 %v139_v33, 16 }
  0x80   :  { %v600_v27 = vsel %vm3787_vm9, %v591_v20, %v4080_v15  ;;  %v352_v36 = vld [vmem:[%s4871_s0 + $0x34] sm:$0xf]  ;;  %v288_v41 = vshrl.u32 %v139_v33, 16  ;;  %v276_v44 = vrot.slane %v274_v34, 5  ;;  %v353_v46 = vld [vmem:[%s4871_s0 + $0x38] sm:$0xf]  ;;  %3187 = vmatpush3.bf16.msra.mxu1 %v3522_v25 }
  0x81   :  { %659 = vst.msk [vmem:[#allocation2 + $0xe8] sm:$0xf] %vm108_vm0, %v600_v27  ;;  %v816_v38 = vld [vmem:[#allocation2 + $0xdc] sm:$0xff]  ;;  %v412_v42 = vrot.slane %v352_v36, 5  ;;  %v280_v45 = vrot.slane %v278_v35, 4  ;;  %v286_v48 = vrot.slane %v284_v40, 5 }
  0x82   :  { %v4108_v39 = vld [vmem:[#allocation2 + $0xcc] ss:$20 sps:$4 sm:$0xff]   ;;  %v4110_v43 = vcombine.low %v813_v23, %v816_v38  ;;  %v467_v47 = vld [vmem:[%s4871_s0 + $0x34] sm:$0xf]  ;;  %v415_v50 = vrot.slane %v353_v46, 5  ;;  %v277_v52 = vsel %vm3745_vm8, %v272_v26, %v276_v44  ;;  %v290_v0 = vrot.slane %v288_v41, 4 }
  0x83   :  { %1921 = vmatprep.mubr.bf16.mxu0 %v4108_v39  ;;  %v413_v49 = vsel %vm3736_vm7, %v411_v22, %v412_v42  ;;  %v414_v37 = vrot.slane %v412_v42, 4  ;;  %v468_v51 = vld [vmem:[%s4871_s0 + $0x38] sm:$0xf]  ;;  %v281_v53 = vor.u32 %v280_v45, %v276_v44  ;;  %v603_v55 = vshrl.u32 %v467_v47, 16  ;;  %v3530_v59 = vld [vmem:[#allocation4 + $0x31c] ss:$12 sps:$4 sm:$0xff]  }
  0x84   :  { %1922 = vmatmul.mubr.bf16.gmra.mxu0 %v4110_v43  ;;  %449 = vst.msk [vmem:[#allocation2 + $0xf8] sm:$0xf] %vm108_vm0, %v413_v49  ;;  %v606_v57 = vshll.u32 %v467_v47, 16  ;;  %v3528_v58 = vld [vmem:[#allocation4 + $0x318] ss:$12 sps:$4 sm:$0xff]   ;;  %v613_v62 = vshrl.u32 %v468_v51, 16  ;;  %2077 = vmatprep.subr.bf16.mxu0 %v3530_v59  ;;  %v291_v22 = vor.u32 %v290_v0, %v286_v48 }
  0x85   :  { %331 = vst.msk [vmem:[#allocation2 + $0xf4] sm:$0xf] %vm108_vm0, %v277_v52  ;;  %v416_v61 = vsel %vm3736_vm7, %v414_v37, %v415_v50  ;;  %v616_v63 = vshll.u32 %v468_v51, 16  ;;  %v282_v4 = vrot.slane %v281_v53, 4  ;;  %v601_v5 = vrot.slane %v4080_v15, 4  ;;  %2078 = vmatpush1.bf16.msra.mxu0 %v3528_v58 }
  0x86   :  { %450 = vst.msk [vmem:[#allocation2 + $0x10c] sm:$0xf] %vm108_vm0, %v416_v61  ;;  %v605_v6 = vrot.slane %v603_v55, 5  ;;  %v608_v8 = vrot.slane %v606_v57, 6  ;;  %v4135_v13 = vld [vmem:[#allocation2 + $0xd0] ss:$20 sps:$4 sm:$0xff]  }
  0x87   :  { %v615_v14 = vrot.slane %v613_v62, 5  ;;  %v287_v18 = vsel %vm3745_vm8, %v282_v4, %v286_v48  ;;  %v618_v20 = vrot.slane %v616_v63, 6  ;;  %v3531_v21 = vld [vmem:[#allocation4 + $0x128] ss:$12 sps:$4 sm:$0xff]   ;;  %v3533_v27 = vld [vmem:[#allocation4 + $0x110] ss:$12 sps:$4 sm:$0xff]  }
  0x88   :  { %v4133_v10 = vld [vmem:[#allocation2 + $0xd4] ss:$20 sps:$4 sm:$0xff]   ;;  %v609_v19 = vor.u32 %v608_v8, %v605_v6  ;;  %332 = vst.msk [vmem:[#allocation2 + $0x108] sm:$0xf] %vm108_vm0, %v287_v18  ;;  %3188 = vmatprep.subr.bf16.mxu1 %v3531_v21  ;;  %v106_v32 = vld [vmem:[%s4871_s0 + $0x38] sm:$0xf] }
  0x89   :  { %2034 = vmatprep.mubr.bf16.mxu1 %v4133_v10  ;;  %v3532_v15 = vld [vmem:[#allocation4 + $0x68] ss:$12 sps:$4 sm:$0xff]   ;;  %v619_v26 = vor.u32 %v618_v20, %v615_v14  ;;  %v3534_v30 = vld [vmem:[#allocation4 + $0x50] ss:$12 sps:$4 sm:$0xff]   ;;  %v417_v34 = vrot.slane %v415_v50, 4  ;;  %v292_v36 = vrot.slane %v291_v22, 4 }
  0x8a   :  { %2035 = vmatmul.mubr.bf16.gmra.mxu1 %v4135_v13  ;;  %v610_v23 = vsel %vm3787_vm9, %v601_v5, %v609_v19  ;;  %v611_v25 = vrot.slane %v609_v19, 4  ;;  %v107_v33 = vld [vmem:[%s4871_s0 + $0x3c] sm:$0xf]  ;;  %123 = vst.msk [vmem:[#allocation2 + $0x118] sm:$0xf] %vm108_vm0, %v106_v32  ;;  %vm2835_vm3 = vcmask 1043459  }
  0x8b   :  { %660 = vst.msk [vmem:[#allocation2 + $0xfc] sm:$0xf] %vm108_vm0, %v610_v23  ;;  %3189 = vmatpush3.bf16.msra.mxu1 %v3532_v15  ;;  %124 = vst.msk [vmem:[#allocation2 + $0x12c] sm:$0xf] %vm108_vm0, %v107_v33  ;;  %v140_v35 = vld [vmem:[%s4871_s0 + $0x3c] sm:$0xf] }
  0x8c   :  { %v620_v31 = vsel %vm3787_vm9, %v611_v25, %v619_v26  ;;  %3190 = vmatprep.subr.bf16.mxu1 %v3533_v27  ;;  %v354_v38 = vld [vmem:[%s4871_s0 + $0x3c] sm:$0xf]  ;;  %v819_v40 = vld [vmem:[#allocation2 + $0xf0] sm:$0xff]  ;;  %v294_v41 = vshll.u32 %v140_v35, 16  ;;  %v298_v42 = vshrl.u32 %v140_v35, 16  ;;  %v621_v46 = vrot.slane %v619_v26, 4 }
  0x8d   :  { %661 = vst.msk [vmem:[#allocation2 + $0x110] sm:$0xf] %vm108_vm0, %v620_v31  ;;  %v418_v44 = vrot.slane %v354_v38, 5  ;;  %v469_v45 = vld [vmem:[%s4871_s0 + $0x3c] sm:$0xf]  ;;  %vm2837_vm4 = vcmask 1044484  }
  0x8e   :  { %v623_v47 = vshrl.u32 %v469_v45, 16  ;;  %v626_v48 = vshll.u32 %v469_v45, 16  ;;  %v3540_v49 = vld [vmem:[#allocation4 + $0x300] ss:$12 sps:$4 sm:$0xff]   ;;  %v296_v51 = vrot.slane %v294_v41, 5  ;;  %v300_v52 = vrot.slane %v298_v42, 4 }
  0x8f   :  { %3191 = vmatpush3.bf16.msra.mxu1 %v3534_v30  ;;  %v822_v37 = vld [vmem:[#allocation2 + $0x104] sm:$0xff]  ;;  %v419_v55 = vsel %vm3736_vm7, %v417_v34, %v418_v44  ;;  %v420_v57 = vrot.slane %v418_v44, 4  ;;  %v336_v59 = vld [vmem:[#allocation2 + $0x130] sm:$0xf]  ;;  %v665_v5 = vld [vmem:[#allocation2 + $0x138] sm:$0x7] }
  0x90   :  { %v4165_v50 = vld [vmem:[#allocation2 + $0xf4] ss:$20 sps:$4 sm:$0xff]   ;;  %v4175_v58 = vcombine.low %v819_v40, %v822_v37  ;;  %451 = vst.msk [vmem:[#allocation2 + $0x120] sm:$0xf] %vm108_vm0, %v419_v55  ;;  %v625_v61 = vrot.slane %v623_v47, 5  ;;  %v628_v62 = vrot.slane %v626_v48, 6  ;;  %v297_v9 = vsel %vm3745_vm8, %v292_v36, %v296_v51 }
  0x91   :  { %v3542_v0 = vld [vmem:[#allocation4 + $0x304] ss:$12 sps:$4 sm:$0xff]   ;;  %1931 = vmatprep.mubr.bf16.mxu0 %v4165_v50  ;;  %v301_v4 = vor.u32 %v300_v52, %v296_v51  ;;  %453 = vst.msk [vmem:[#allocation2 + $0x134] sm:$0x7] %vm452_vm10, %v420_v57  ;;  %v4192_v19 = vld [vmem:[#allocation2 + $0xf8] ss:$20 sps:$4 sm:$0xff]  }
  0x92   :  { %v3543_v6 = vld [vmem:[#allocation4 + $0xf8] ss:$12 sps:$4 sm:$0xff]   ;;  %1932 = vmatmul.mubr.bf16.gmra.mxu0 %v4175_v58  ;;  %333 = vst.msk [vmem:[#allocation2 + $0x11c] sm:$0xf] %vm108_vm0, %v297_v9  ;;  %v629_v8 = vor.u32 %v628_v62, %v625_v61  ;;  %2079 = vmatprep.subr.bf16.mxu0 %v3542_v0  ;;  %v3545_v23 = vld [vmem:[#allocation4 + $0xe0] ss:$12 sps:$4 sm:$0xff]  }
  0x93   :  { %v3544_v14 = vld [vmem:[#allocation4 + $0x38] ss:$12 sps:$4 sm:$0xff]   ;;  %v302_v20 = vrot.slane %v301_v4, 4  ;;  %3192 = vmatprep.subr.bf16.mxu1 %v3543_v6  ;;  %2080 = vmatpush1.bf16.msra.mxu0 %v3540_v49  ;;  %v3546_v25 = vld [vmem:[#allocation4 + $0x20] ss:$12 sps:$4 sm:$0xff]   ;;  %vm2839_vm5 = vcmask 1045509  }
  0x94   :  { %v4190_v18 = vld [vmem:[#allocation2 + $0xfc] ss:$20 sps:$4 sm:$0xff]   ;;  %v630_v17 = vsel %vm3787_vm9, %v621_v46, %v629_v8  ;;  %v631_v21 = vrot.slane %v629_v8, 4  ;;  %3193 = vmatpush3.bf16.msra.mxu1 %v3544_v14  ;;  %v668_v26 = vld [vmem:[%s4871_s0] sm:$0xc]  ;;  %vm2841_vm6 = vcmask 1046534  }
  0x95   :  { %2044 = vmatprep.mubr.bf16.mxu1 %v4190_v18  ;;  %v337_v22 = vsel %vm4169_vm12, %v302_v20, %v336_v59  ;;  %662 = vst.msk [vmem:[#allocation2 + $0x124] sm:$0xf] %vm108_vm0, %v630_v17  ;;  %v669_v27 = vld [vmem:[%s4871_s0 + $0x4] sm:$0xf]  ;;  %3194 = vmatprep.subr.bf16.mxu1 %v3545_v23  ;;  %v670_v30 = vld [vmem:[%s4871_s0 + $0x8] sm:$0xf] }
  0x96   :  { %2045 = vmatmul.mubr.bf16.gmra.mxu1 %v4192_v19  ;;  %338 = vst [vmem:[#allocation2 + $0x130] sm:$0xf] %v337_v22  ;;  %v666_v54 = vsel %vm4180_vm13, %v631_v21, %v665_v5  ;;  %v3021_v31 = vrot.slane %v668_v26, 10  ;;  %v705_v32 = vrot.slane %v669_v27, 6  ;;  %v708_v33 = vrot.slane %v670_v30, 6 }
  0x97   :  { %667 = vst [vmem:[#allocation2 + $0x138] sm:$0x7] %v666_v54  ;;  %v3548_v34 = vld [vmem:[#allocation4 + $0xc8] ss:$12 sps:$4 sm:$0xff]   ;;  %v3549_v40 = vld [vmem:[#allocation4 + $0x2f0] ss:$12 sps:$4 sm:$0xff]  }
  0x98   :  { %3195 = vmatpush3.bf16.msra.mxu1 %v3546_v25  ;;  %v706_v36 = vsel %vm4197_vm15, %v3021_v31, %v705_v32  ;;  %v707_v38 = vrot.slane %v705_v32, 4  ;;  %v3550_v42 = vld [vmem:[#allocation4 + $0x8] ss:$12 sps:$4 sm:$0xff]   ;;  %3246 = vmatprep.subr.bf16.mxu0 %v3549_v40  ;;  %v710_v45 = vrot.slane %v708_v33, 4  ;;  %v672_v48 = vld [vmem:[%s4871_s0 + $0x10] sm:$0xf] }
  0x99   :  { %v825_v35 = vld [vmem:[#allocation2 + $0x118] sm:$0xff]  ;;  %766 = vst.msk [vmem:[#allocation2 + $0x10] sm:$0xf] %vm108_vm0, %v706_v36  ;;  %3196 = vmatprep.subr.bf16.mxu1 %v3548_v34  ;;  %v671_v44 = vld [vmem:[%s4871_s0 + $0xc] sm:$0xf]  ;;  %v714_v53 = vrot.slane %v672_v48, 6 }
  0x9a   :  { %v709_v41 = vsel %vm4197_vm15, %v707_v38, %v708_v33  ;;  %v711_v49 = vrot.slane %v671_v44, 6  ;;  %v4235_v52 = vld [vmem:[#allocation2 + $0x120] ss:$20 sps:$4 sm:$0xff]   ;;  %v3581_v62 = vld [vmem:[#allocation2 + $0x4] ss:$20 sps:$4 sm:$0xff]   ;;  %vm2843_vm7 = vcmask 1047559  }
  0x9b   :  { %767 = vst.msk [vmem:[#allocation2 + $0x24] sm:$0xf] %vm108_vm0, %v709_v41  ;;  %v673_v61 = vld [vmem:[%s4871_s0 + $0x14] sm:$0xf]  ;;  %v674_v63 = vld [vmem:[%s4871_s0 + $0x18] sm:$0xf] }
  0x9c   :  { %3197 = vmatpush3.bf16.msra.mxu1 %v3550_v42  ;;  %v712_v55 = vsel %vm4197_vm15, %v710_v45, %v711_v49  ;;  %v713_v57 = vrot.slane %v711_v49, 4  ;;  %v716_v0 = vrot.slane %v714_v53, 4  ;;  %v717_v9 = vrot.slane %v673_v61, 6  ;;  %v3551_v4 = vld [vmem:[#allocation4 + $0x230] ss:$12 sps:$4 sm:$0xff]  }
  0x9d   :  { %v828_v46 = vld [vmem:[#allocation2 + $0x12c] sm:$0xff]  ;;  %768 = vst.msk [vmem:[#allocation2 + $0x38] sm:$0xf] %vm108_vm0, %v712_v55  ;;  %v720_v5 = vrot.slane %v674_v63, 6  ;;  %v3553_v20 = vld [vmem:[#allocation4 + $0x2d8] ss:$12 sps:$4 sm:$0xff]  }
  0x9e   :  { %v4226_v47 = vld [vmem:[#allocation2 + $0x11c] ss:$20 sps:$4 sm:$0xff]   ;;  %v4231_v37 = vld [vmem:[#allocation2 + $0x124] ss:$20 sps:$4 sm:$0xff]   ;;  %v4233_v51 = vcombine.low %v825_v35, %v828_v46  ;;  %v715_v59 = vsel %vm4197_vm15, %v713_v57, %v714_v53  ;;  %v718_v8 = vsel %vm4197_vm15, %v716_v0, %v717_v9  ;;  %v719_v14 = vrot.slane %v717_v9, 4 }
  0x9f   :  { %1941 = vmatprep.mubr.bf16.mxu0 %v4226_v47  ;;  %2054 = vmatprep.mubr.bf16.mxu1 %v4231_v37  ;;  %769 = vst.msk [vmem:[#allocation2 + $0x4c] sm:$0xf] %vm108_vm0, %v715_v59  ;;  %770 = vst.msk [vmem:[#allocation2 + $0x60] sm:$0xf] %vm108_vm0, %v718_v8  ;;  %v675_v21 = vld [vmem:[%s4871_s0 + $0x1c] sm:$0xf] }
  0xa0   :  { %1942 = vmatmul.mubr.bf16.gmra.mxu0 %v4233_v51  ;;  %2055 = vmatmul.mubr.bf16.gmra.mxu1 %v4235_v52  ;;  %v721_v17 = vsel %vm4197_vm15, %v719_v14, %v720_v5  ;;  %v676_v22 = vld [vmem:[%s4871_s0 + $0x20] sm:$0xf]  ;;  %v722_v23 = vrot.slane %v720_v5, 4  ;;  %v723_v54 = vrot.slane %v675_v21, 6  ;;  %v3554_v26 = vld [vmem:[#allocation4 + $0x218] ss:$12 sps:$4 sm:$0xff]  }
  0xa1   :  { %2097 = vmatprep.mubr.bf16.mxu0 %v3615_v1  ;;  %2210 = vmatprep.mubr.bf16.mxu1 %v3581_v62  ;;  %771 = vst.msk [vmem:[#allocation2 + $0x74] sm:$0xf] %vm108_vm0, %v721_v17  ;;  %v726_v25 = vrot.slane %v676_v22, 6  ;;  %v3582_v27 = vld [vmem:[#allocation2] ss:$20 sps:$4 sm:$0xff]   ;;  %vm3617_vm8 = vmmov 0  }
  0xa2   :  { %v4254_v6 = vld [vmem:[#allocation2 + $0x10] ss:$20 sps:$4 sm:$0xff]   ;;  %v724_v31 = vsel %vm4197_vm15, %v722_v23, %v723_v54  ;;  %v725_v32 = vrot.slane %v723_v54, 4  ;;  %v3583_v36 = vld [vmem:[#allocation2 + $0x2c] ss:$20 sps:$4 sm:$0xff]   ;;  %vm3013_vm9 = vcmask 57344  }
  0xa3   :  { %v3556_v30 = vld [vmem:[#allocation4 + $0x2c0] ss:$12 sps:$4 sm:$0xff]   ;;  %v728_v33 = vrot.slane %v726_v25, 4  ;;  %772 = vst.msk [vmem:[#allocation2 + $0x88] sm:$0xf] %vm108_vm0, %v724_v31 }
  0xa4   :  { %v677_v35 = vld [vmem:[%s4871_s0 + $0x24] sm:$0xf]  ;;  %v727_v38 = vsel %vm4197_vm15, %v725_v32, %v726_v25  ;;  %v678_v40 = vld [vmem:[%s4871_s0 + $0x28] sm:$0xf]  ;;  %v3564_v55 = vld [vmem:[#allocation4 + $0x3b0] ss:$12 sps:$4 sm:$0xff]  }
  0xa5   :  { %v729_v41 = vrot.slane %v677_v35, 6  ;;  %773 = vst.msk [vmem:[#allocation2 + $0x9c] sm:$0xf] %vm108_vm0, %v727_v38  ;;  %v732_v42 = vrot.slane %v678_v40, 6  ;;  %v3557_v46 = vld [vmem:[#allocation4 + $0x200] ss:$12 sps:$4 sm:$0xff]   ;;  %3328 = vmatprep.subr.bf16.mxu1 %v3564_v55 }
  0xa6   :  { %v4272_v34 = vld [vmem:[#allocation2 + $0x38] ss:$20 sps:$4 sm:$0xff]   ;;  %v680_v59 = vld [vmem:[%s4871_s0 + $0x30] sm:$0xf]  ;;  %v681_v22 = vld [vmem:[%s4871_s0 + $0x34] sm:$0xf] }
  0xa7   :  { %v730_v44 = vsel %vm4197_vm15, %v728_v33, %v729_v41  ;;  %v731_v45 = vrot.slane %v729_v41, 4  ;;  %v3559_v48 = vld [vmem:[#allocation4 + $0x2a8] ss:$12 sps:$4 sm:$0xff]   ;;  %v734_v61 = vrot.slane %v732_v42, 4  ;;  %v738_v63 = vrot.slane %v680_v59, 6 }
  0xa8   :  { %2098 = vmatmul.mubr.bf16.vlgmr.msra.gmra.mxu0 %v4254_v6  ;;  %2211 = vmatmul.mubr.bf16.vlgmr.msra.gmra.mxu1 %v3582_v27  ;;  %774 = vst.msk [vmem:[#allocation2 + $0xb0] sm:$0xf] %vm108_vm0, %v730_v44  ;;  %v3560_v53 = vld [vmem:[#allocation4 + $0x1e8] ss:$12 sps:$4 sm:$0xff]   ;;  %v3562_v0 = vld [vmem:[#allocation4 + $0x290] ss:$12 sps:$4 sm:$0xff]  }
  0xa9   :  { %3247 = vmatpush3.bf16.msra.mxu0 %v3551_v4  ;;  %2107 = vmatprep.mubr.bf16.mxu0 %v3615_v1  ;;  %v733_v49 = vsel %vm4197_vm15, %v731_v45, %v732_v42  ;;  %v679_v57 = vld [vmem:[%s4871_s0 + $0x2c] sm:$0xf]  ;;  %v4300_v9 = vld [vmem:[#allocation2 + $0x60] ss:$20 sps:$4 sm:$0xff]   ;;  %v740_v17 = vrot.slane %v738_v63, 4  ;;  %v741_v54 = vrot.slane %v681_v22, 6 }
  0xaa   :  { %3248 = vmatprep.subr.bf16.mxu0 %v3553_v20  ;;  %2218 = vmatprep.mubr.bf16.mxu1 %v3583_v36  ;;  %775 = vst.msk [vmem:[#allocation2 + $0xc4] sm:$0xf] %vm108_vm0, %v733_v49  ;;  %v735_v62 = vrot.slane %v679_v57, 6  ;;  %v3563_v8 = vld [vmem:[#allocation4 + $0x1d0] ss:$12 sps:$4 sm:$0xff]  }
  0xab   :  { %3329 = vmatpush3.bf16.msra.mxu1 %v3564_v55  ;;  %v3569_v20 = vld [vmem:[#allocation4 + $0x380] ss:$12 sps:$4 sm:$0xff]   ;;  %v3568_v21 = vld [vmem:[#allocation4 + $0x1b8] ss:$12 sps:$4 sm:$0xff]   ;;  %v742_v31 = vsel %vm4197_vm15, %v740_v17, %v741_v54  ;;  %v743_v32 = vrot.slane %v741_v54, 4 }
  0xac   :  { %v736_v4 = vsel %vm4197_vm15, %v734_v61, %v735_v62  ;;  %v737_v5 = vrot.slane %v735_v62, 4  ;;  %v682_v23 = vld [vmem:[%s4871_s0 + $0x38] sm:$0xf]  ;;  %v4317_v27 = vld [vmem:[#allocation2 + $0x88] ss:$20 sps:$4 sm:$0xff]  }
  0xad   :  { %3249 = vmatpush3.bf16.msra.mxu0 %v3554_v26  ;;  %776 = vst.msk [vmem:[#allocation2 + $0xd8] sm:$0xf] %vm108_vm0, %v736_v4  ;;  %v744_v25 = vrot.slane %v682_v23, 6  ;;  %v3571_v26 = vld [vmem:[#allocation4 + $0x260] ss:$12 sps:$4 sm:$0xff]  }
  0xae   :  { %3250 = vmatprep.subr.bf16.mxu0 %v3556_v30  ;;  %v739_v14 = vsel %vm4197_vm15, %v737_v5, %v738_v63  ;;  %v3572_v30 = vld [vmem:[#allocation4 + $0x368] ss:$12 sps:$4 sm:$0xff]   ;;  %778 = vst.msk [vmem:[#allocation2 + $0x100] sm:$0xf] %vm108_vm0, %v742_v31  ;;  %v3573_v35 = vld [vmem:[#allocation4 + $0x1a0] ss:$12 sps:$4 sm:$0xff]  }
  0xaf   :  { %777 = vst.msk [vmem:[#allocation2 + $0xec] sm:$0xf] %vm108_vm0, %v739_v14  ;;  %v745_v33 = vsel %vm4197_vm15, %v743_v32, %v744_v25  ;;  %v683_v36 = vld [vmem:[%s4871_s0 + $0x3c] sm:$0xf]  ;;  %v3576_v40 = vld [vmem:[#allocation4 + $0x248] ss:$12 sps:$4 sm:$0xff]  }
  0xb0   :  { %2108 = vmatmul.mubr.bf16.gmra.mxu0 %v4272_v34  ;;  %2219 = vmatmul.mubr.bf16.gmra.mxu1 %v3886_v24  ;;  %v3567_v24 = vld [vmem:[#allocation4 + $0x398] ss:$12 sps:$4 sm:$0xff]   ;;  %779 = vst.msk [vmem:[#allocation2 + $0x114] sm:$0xf] %vm108_vm0, %v745_v33  ;;  %v747_v38 = vrot.slane %v683_v36, 6 }
  0xb1   :  { %2117 = vmatprep.mubr.bf16.mxu0 %v3615_v1  ;;  %3251 = vmatpush3.bf16.msra.mxu0 %v3557_v46  ;;  %v3577_v41 = vld [vmem:[#allocation4 + $0x338] ss:$12 sps:$4 sm:$0xff]   ;;  %v3578_v45 = vld [vmem:[#allocation4 + $0x188] ss:$12 sps:$4 sm:$0xff]  }
  0xb2   :  { %2226 = vmatprep.mubr.bf16.mxu1 %v3941_v11  ;;  %3252 = vmatprep.subr.bf16.mxu0 %v3559_v48  ;;  %v3566_v11 = vld [vmem:[#allocation4 + $0x278] ss:$12 sps:$4 sm:$0xff]   ;;  %v749_v44 = vrot.slane %v747_v38, 4  ;;  %v3580_v15 = vld [vmem:[#allocation4 + $0x308] ss:$12 sps:$4 sm:$0xff]  }
  0xb3   :  { %3330 = vmatprep.subr.bf16.mxu1 %v3567_v24  ;;  %v3561_v46 = vld [vmem:[#allocation2 + $0xb0] ss:$20 sps:$4 sm:$0xff]  }
  0xb4   :  { %3331 = vmatpush3.bf16.msra.mxu1 %v3567_v24  ;;  %782 = vst.msk [vmem:[#allocation2 + $0x13c] sm:$0x3] %vm781_vm1, %v749_v44 }
  0xb5   :  { %3253 = vmatpush3.bf16.msra.mxu0 %v3560_v53  ;;  %3332 = vmatprep.subr.bf16.mxu1 %v3569_v20 }
  0xb6   :  { %3254 = vmatprep.subr.bf16.mxu0 %v3562_v0 }
  0xb7   :  { %v3570_v48 = vld [vmem:[#allocation2 + $0x100] ss:$20 sps:$4 sm:$0xff]  }
  0xb8   :  { %2118 = vmatmul.mubr.bf16.gmra.mxu0 %v4300_v9  ;;  %2227 = vmatmul.mubr.bf16.gmra.mxu1 %v3947_v16  ;;  %v746_v16 = vrot.slane %v744_v25, 4 }
  0xb9   :  { %2127 = vmatprep.mubr.bf16.mxu0 %v3615_v1  ;;  %2234 = vmatprep.mubr.bf16.mxu1 %v4002_v3  ;;  %v3574_v3 = vld [vmem:[#allocation4 + $0x350] ss:$12 sps:$4 sm:$0xff]  }
  0xba   :  { %3255 = vmatpush3.bf16.msra.mxu0 %v3563_v8  ;;  %3333 = vmatpush3.bf16.msra.mxu1 %v3569_v20  ;;  %v748_v42 = vsel %vm4197_vm15, %v746_v16, %v747_v38 }
  0xbb   :  { %3256 = vmatprep.subr.bf16.mxu0 %v3566_v11  ;;  %3334 = vmatprep.subr.bf16.mxu1 %v3572_v30  ;;  %780 = vst.msk [vmem:[#allocation2 + $0x128] sm:$0xf] %vm108_vm0, %v748_v42  ;;  %vm2831_vm0 = vcmask 1041409  }
  0xbe   :  { %3257 = vmatpush3.bf16.msra.mxu0 %v3568_v21  ;;  %3335 = vmatpush3.bf16.msra.mxu1 %v3572_v30 }
  0xbf   :  { %3258 = vmatprep.subr.bf16.mxu0 %v3571_v26  ;;  %3336 = vmatprep.subr.bf16.mxu1 %v3574_v3 }
  0xc0   :  { %2128 = vmatmul.mubr.bf16.gmra.mxu0 %v4317_v27  ;;  %2235 = vmatmul.mubr.bf16.gmra.mxu1 %v4005_v7  ;;  %v3579_v7 = vld [vmem:[#allocation4 + $0x320] ss:$12 sps:$4 sm:$0xff]  }
  0xc1   :  { %2137 = vmatprep.mubr.bf16.mxu0 %v3615_v1  ;;  %2242 = vmatprep.mubr.bf16.mxu1 %v4062_v56  ;;  %v3565_v56 = vld [vmem:[#allocation2 + $0xd8] ss:$20 sps:$4 sm:$0xff]  }
  0xc2   :  { %3259 = vmatpush3.bf16.msra.mxu0 %v3573_v35  ;;  %3337 = vmatpush3.bf16.msra.mxu1 %v3574_v3 }
  0xc3   :  { %3260 = vmatprep.subr.bf16.mxu0 %v3576_v40  ;;  %3338 = vmatprep.subr.bf16.mxu1 %v3577_v41 }
  0xc6   :  { %3261 = vmatpush3.bf16.msra.mxu0 %v3578_v45  ;;  %3339 = vmatpush3.bf16.msra.mxu1 %v3577_v41 }
  0xc7   :  { %3340 = vmatprep.subr.bf16.mxu1 %v3579_v7 }
  0xc8   :  { %2138 = vmatmul.mubr.bf16.gmra.mxu0 %v3561_v46  ;;  %2243 = vmatmul.mubr.bf16.gmra.mxu1 %v4066_v60  ;;  %v3575_v60 = vld [vmem:[#allocation2 + $0x128] ss:$20 sps:$4 sm:$0xff]  }
  0xc9   :  { %2147 = vmatprep.mubr.bf16.mxu0 %v3615_v1  ;;  %2250 = vmatprep.mubr.bf16.mxu1 %v4108_v39  ;;  %v3584_v39 = vld [vmem:[#allocation2 + $0xc] ss:$20 sps:$4 sm:$0xff]  }
  0xca   :  { %3341 = vmatpush3.bf16.msra.mxu1 %v3579_v7 }
  0xcb   :  { %3342 = vmatprep.subr.bf16.mxu1 %v3580_v15 }
  0xce   :  { %3343 = vmatpush3.bf16.msra.mxu1 %v3580_v15 }
  0xd0   :  { %2148 = vmatmul.mubr.bf16.gmra.mxu0 %v3565_v56  ;;  %2251 = vmatmul.mubr.bf16.gmra.mxu1 %v4110_v43  ;;  %v3585_v43 = vld [vmem:[#allocation2 + $0x8] ss:$20 sps:$4 sm:$0xff]  }
  0xd1   :  { %2157 = vmatprep.mubr.bf16.mxu0 %v3615_v1  ;;  %2258 = vmatprep.mubr.bf16.mxu1 %v4165_v50  ;;  %v3586_v50 = vld [vmem:[#allocation2 + $0x34] ss:$20 sps:$4 sm:$0xff]  }
  0xd8   :  { %2158 = vmatmul.mubr.bf16.gmra.mxu0 %v3570_v48  ;;  %2259 = vmatmul.mubr.bf16.gmra.mxu1 %v4175_v58  ;;  %v3587_v58 = vld [vmem:[#allocation2 + $0x30] ss:$20 sps:$4 sm:$0xff]  }
  0xd9   :  { %2167 = vmatprep.mubr.bf16.mxu0 %v3615_v1  ;;  %2266 = vmatprep.mubr.bf16.mxu1 %v4226_v47  ;;  %v3588_v1 = vld [vmem:[#allocation2 + $0x5c] ss:$20 sps:$4 sm:$0xff]   ;;  %v3589_v47 = vld [vmem:[#allocation2 + $0x58] ss:$20 sps:$4 sm:$0xff]  }
  0xe0   :  { %2168 = vmatmul.mubr.bf16.gmra.mxu0 %v3575_v60  ;;  %2267 = vmatmul.mubr.bf16.gmra.mxu1 %v4233_v51 }
  0xe1   :  { %2307 = vmatprep.mubr.bf16.mxu0 %v3584_v39  ;;  %3344 = vmatprep.mubr.bf16.mxu1 %v4254_v6 }
  0xe8   :  { %2308 = vmatmul.mubr.bf16.vlgmr.msra.gmra.mxu0 %v3585_v43  ;;  %3345 = vmatmul.mubr.bf16.vlgmr.msra.gmra.mxu1 %v4272_v34 }
  0xe9   :  { %2315 = vmatprep.mubr.bf16.mxu0 %v3586_v50  ;;  %3348 = vmatprep.mubr.bf16.mxu1 %v4300_v9 }
  0xf0   :  { %2316 = vmatmul.mubr.bf16.gmra.mxu0 %v3587_v58  ;;  %3349 = vmatmul.mubr.bf16.gmra.mxu1 %v4317_v27 }
  0xf1   :  { %2323 = vmatprep.mubr.bf16.mxu0 %v3588_v1  ;;  %3352 = vmatprep.mubr.bf16.mxu1 %v3561_v46 }
  0xf8   :  { %2324 = vmatmul.mubr.bf16.gmra.mxu0 %v3589_v47  ;;  %3353 = vmatmul.mubr.bf16.gmra.mxu1 %v3565_v56 }
  0xf9   :  { %2331 = vmatprep.mubr.bf16.mxu0 %v4031_v28  ;;  %3356 = vmatprep.mubr.bf16.mxu1 %v3570_v48 }
 0x100   :  { %2332 = vmatmul.mubr.bf16.gmra.mxu0 %v4033_v29  ;;  %3357 = vmatmul.mubr.bf16.gmra.mxu1 %v3575_v60 }
 0x101   :  { %2339 = vmatprep.mubr.bf16.mxu0 %v4076_v2 }
 0x108   :  { %2340 = vmatmul.mubr.bf16.gmra.mxu0 %v4078_v12 }
 0x109   :  { %2347 = vmatprep.mubr.bf16.mxu0 %v4133_v10 }
 0x110   :  { %2348 = vmatmul.mubr.bf16.gmra.mxu0 %v4135_v13 }
 0x111   :  { %2355 = vmatprep.mubr.bf16.mxu0 %v4190_v18  ;;  %v1873_v51 = vpop.f32.mrf.mxu0 }
 0x113   :  { %v1875_v6 = vpop.f32.mrf.mxu0  ;;  %v1986_v28 = vpop.f32.mrf.mxu1 }
 0x114   :  { %v4359_v34 = vadd.f32 %v1986_v28, %v1873_v51 }
 0x115   :  { %v1877_v29 = vpop.f32.mrf.mxu0  ;;  %v1988_v2 = vpop.f32.mrf.mxu1 }
 0x116   :  { %v4361_v49 = vadd.f32 %v1988_v2, %v1875_v6  ;;  %v2471_v6 = vlaneseq }
 0x117   :  { %v1879_v12 = vpop.f32.mrf.mxu0  ;;  %v1990_v53 = vpop.f32.mrf.mxu1 }
 0x118   :  { %2356 = vmatmul.mubr.bf16.gmra.mxu0 %v4192_v19  ;;  %v4363_v10 = vadd.f32 %v1990_v53, %v1877_v29  ;;  %v4450_v2 = vshrl.u32 %v2471_v6, 7 }
 0x119   :  { %2363 = vmatprep.mubr.bf16.mxu0 %v4231_v37  ;;  %v1883_v13 = vpop.f32.mrf.mxu0  ;;  %v1992_v55 = vpop.f32.mrf.mxu1 }
 0x11a   :  { %v4365_v18 = vadd.f32 %v1992_v55, %v1879_v12  ;;  %4894 = vst [vmem:[#allocation9_spill] sm:$0xff] %v4450_v2 }
 0x11b   :  { %v1885_v57 = vpop.f32.mrf.mxu0 }
 0x11c   :  { %v1996_v19 = vpop.f32.mrf.mxu1 }
 0x11d   :  { %v4368_v59 = vadd.f32 %v1996_v19, %v1883_v13  ;;  %v1887_v37 = vpop.f32.mrf.mxu0 }
 0x11e   :  { %v1998_v61 = vpop.f32.mrf.mxu1 }
 0x11f   :  { %v4370_v62 = vadd.f32 %v1998_v61, %v1885_v57  ;;  %v1889_v63 = vpop.f32.mrf.mxu0  ;;  %v4878_v57 = vsub.s32 0, %v4450_v2 }
 0x120   :  { %2364 = vmatmul.mubr.bf16.gmra.mxu0 %v4235_v52  ;;  %v2000_v0 = vpop.f32.mrf.mxu1 }
 0x121   :  { %v4372_v9 = vadd.f32 %v2000_v0, %v1887_v37  ;;  %v2469_v37 = vld [vmem:[%s4873_s2] sm:$0x7] }
 0x122   :  { %v1893_v4 = vpop.f32.mrf.mxu0  ;;  %v2002_v5 = vpop.f32.mrf.mxu1 }
 0x123   :  { %v4374_v8 = vadd.f32 %v2002_v5, %v1889_v63  ;;  %v2477_v63 = vsub.s32 1, %v4450_v2  ;;  %v4475_v5 = vrot.slane %v2469_v37, %v4878_v57 }
 0x124   :  { %v1895_v24 = vpop.f32.mrf.mxu0 }
 0x126   :  { %v1897_v14 = vpop.f32.mrf.mxu0 }
 0x128   :  { %v2006_v11 = vpop.f32.mrf.mxu1  ;;  %v4378_v52 = vpop.f32.mrf.mxu0 }
 0x129   :  { %v4376_v20 = vadd.f32 %v2006_v11, %v1893_v4  ;;  %v4478_v11 = vrot.slane %v2469_v37, %v2477_v63 }
 0x12a   :  { %v2008_v17 = vpop.f32.mrf.mxu1 }
 0x12b   :  { %v4380_v21 = vadd.f32 %v2008_v17, %v1895_v24 }
 0x12c   :  { %v2010_v22 = vpop.f32.mrf.mxu1 }
 0x12d   :  { %v4382_v23 = vadd.f32 %v2010_v22, %v1897_v14 }
 0x12e   :  { %v4386_v25 = vpop.f32.mrf.mxu1 }
 0x12f   :  { %v4384_v54 = vpop.f32.mrf.mxu0 }
 0x131   :  { %v4388_v26 = vpop.f32.mrf.mxu0 }
 0x133   :  { %v4390_v27 = vpop.f32.mrf.mxu0  ;;  %v4392_v30 = vpop.f32.mrf.mxu1 }
 0x135   :  { %v4394_v31 = vpop.f32.mrf.mxu0  ;;  %v4396_v32 = vpop.f32.mrf.mxu1 }
 0x137   :  { %v4398_v16 = vpop.f32.mrf.mxu1 }
 0x139   :  { %v4402_v35 = vpop.f32.mrf.mxu1 }
 0x13a   :  { %v4400_v33 = vpop.f32.mrf.mxu0 }
 0x13c   :  { %v4404_v3 = vpop.f32.mrf.mxu0 }
 0x13d   :  { %v4406_v36 = vpop.f32.mrf.mxu1 }
 0x13e   :  { %v4408_v38 = vpop.f32.mrf.mxu0 }
 0x13f   :  { %v4410_v40 = vpop.f32.mrf.mxu1 }
 0x140   :  { %v4412_v41 = vpop.f32.mrf.mxu0 }
 0x141   :  { %v4414_v42 = vpop.f32.mrf.mxu1 }
 0x143   :  { %v4418_v45 = vpop.f32.mrf.mxu1 }
 0x144   :  { %v4416_v44 = vpop.f32.mrf.mxu0 }
 0x146   :  { %v4420_v46 = vpop.f32.mrf.mxu0 }
 0x148   :  { %v4424_v15 = vpop.f32.mrf.mxu0 }
 0x14a   :  { %v4422_v7 = vpop.f32.mrf.mxu1  ;;  %v4430_v60 = vpop.f32.mrf.mxu0 }
 0x14c   :  { %v4426_v56 = vpop.f32.mrf.mxu1 }
 0x14e   :  { %v4428_v48 = vpop.f32.mrf.mxu1 }
 0x150   :  { %v4432_v39 = vpop.f32.mrf.mxu1 }
 0x152   :  { %v4434_v43 = vpop.f32.mrf.mxu0 }
 0x154   :  { %v4436_v50 = vpop.f32.mrf.mxu0 }
 0x156   :  { %v4438_v58 = vpop.f32.mrf.mxu1  ;;  %v4442_v47 = vpop.f32.mrf.mxu0 }
 0x158   :  { %v4440_v1 = vpop.f32.mrf.mxu1  ;;  %v4446_v28 = vpop.f32.mrf.mxu0 }
 0x159   :  { %4892 = vst [vmem:[#allocation7_spill] sm:$0xff] %v4446_v28 }
 0x15a   :  { %v4444_v51 = vpop.f32.mrf.mxu1 }
 0x15c   :  { %v4448_v29 = vpop.f32.mrf.mxu1 }
 0x15d   :  { %4893 = vst [vmem:[#allocation8_spill] sm:$0xff] %v4448_v29 }
 0x160   :  { %v4452_v12 = vpop.f32.mrf.mxu0  ;;  %v4454_v53 = vpop.f32.mrf.mxu1 }
 0x161   :  { %4895 = vst [vmem:[#allocation10_spill] sm:$0xff] %v4452_v12  ;;  %4896 = vst [vmem:[#allocation11_spill] sm:$0xff] %v4454_v53 }
 0x162   :  { %v4456_v13 = vpop.f32.mrf.mxu0  ;;  %v4458_v55 = vpop.f32.mrf.mxu1 }
 0x163   :  { %4897 = vst [vmem:[#allocation12_spill] sm:$0xff] %v4456_v13  ;;  %4898 = vst [vmem:[#allocation13_spill] sm:$0xff] %v4458_v55 }
 0x164   :  { %v4461_v19 = vpop.f32.mrf.mxu0  ;;  %v4466_v61 = vpop.f32.mrf.mxu1 }
 0x165   :  { %4899 = vst [vmem:[#allocation14_spill] sm:$0xff] %v4461_v19  ;;  %4900 = vst [vmem:[#allocation15_spill] sm:$0xff] %v4466_v61 }
 0x166   :  { %v4469_v0 = vpop.f32.mrf.mxu0  ;;  %v4471_v4 = vpop.f32.mrf.mxu1 }
 0x167   :  { %4901 = vst [vmem:[#allocation16_spill] sm:$0xff] %v4469_v0  ;;  %4902 = vst [vmem:[#allocation17_spill] sm:$0xff] %v4471_v4 }
 0x168   :  { %v2099_v24 = vpop.f32.mrf.mxu0  ;;  %v3198_v17 = vpop.f32.mrf.mxu1 }
 0x169   :  { %v2100_v14 = vadd.f32 %v2099_v24, %v4359_v34 }
 0x16a   :  { %v2101_v22 = vpop.f32.mrf.mxu0  ;;  %v3199_v19 = vpop.f32.mrf.mxu1 }
 0x16b   :  { %v2486_v6 = vadd.f32 %v4475_v5, %v2100_v14  ;;  %v2102_v61 = vadd.f32 %v2101_v22, %v4361_v49  ;;  %v4482_v0 = vadd.f32 %v3199_v19, %v3198_v17  ;;  %v4491_v49 = vld [vmem:[%s4874_s3] sm:$0xff]  ;;  %v4496_v19 = vld [vmem:[%s4874_s3 + $0x18] sm:$0xff]  ;;  %v4506_v22 = vld [vmem:[%s4874_s3 + $0x8] sm:$0xff] }
 0x16c   :  { %v2103_v55 = vpop.f32.mrf.mxu0  ;;  %v3201_v13 = vpop.f32.mrf.mxu1 }
 0x16d   :  { %4903 = vst [vmem:[#allocation18_spill] sm:$0xff] %v4482_v0  ;;  %v2487_v4 = vadd.f32 %v4478_v11, %v2102_v61  ;;  %v2104_v57 = vadd.f32 %v2103_v55, %v4363_v10  ;;  %v2534_v12 = vmax.f32 %v2486_v6, 0.0  ;;  %v2481_v55 = vsub.s32 2, %v4450_v2  ;;  %v4511_v6 = vld [vmem:[%s4874_s3 + $0x20] sm:$0xff] }
 0x16e   :  { %v2105_v53 = vpop.f32.mrf.mxu0  ;;  %v3202_v24 = vpop.f32.mrf.mxu1 }
 0x16f   :  { %v2489_v34 = vadd.f32 %v4475_v5, %v2104_v57  ;;  %v2106_v63 = vadd.f32 %v2105_v53, %v4365_v18  ;;  %v4498_v10 = vadd.f32 %v3202_v24, %v3201_v13  ;;  %v2535_v14 = vmax.f32 %v2487_v4, 0.0 }
 0x170   :  { %v2109_v61 = vpop.f32.mrf.mxu0  ;;  %v3204_v17 = vpop.f32.mrf.mxu1  ;;  %v2588_v24 = vmul.f32 %v4491_v49, %v2534_v12  ;;  %v4523_v29 = vrot.slane %v2469_v37, %v2481_v55 }
 0x171   :  { %4904 = vst [vmem:[#allocation19_spill] sm:$0xff] %v4498_v10  ;;  %v2537_v57 = vmax.f32 %v2489_v34, 0.0  ;;  %v2490_v18 = vadd.f32 %v4478_v11, %v2106_v63  ;;  %v2110_v53 = vadd.f32 %v2109_v61, %v4368_v59  ;;  %v4518_v61 = vadd.f32 %v4386_v25, %v4378_v52 }
 0x172   :  { %v2111_v13 = vpop.f32.mrf.mxu0  ;;  %v3205_v59 = vpop.f32.mrf.mxu1  ;;  %v2589_v28 = vmul.f32 %v4506_v22, %v2535_v14  ;;  %v4532_v52 = vadd.f32 %v4396_v32, %v4388_v26  ;;  %v4536_v25 = vadd.f32 %v4398_v16, %v4390_v27  ;;  %v2805_v14 = vld [vmem:[%s4875_s4 + $0x8] sm:$0xff]  ;;  %v4552_v26 = vadd.f32 %v4410_v40, %v4404_v3 }
 0x173   :  { %v2591_v4 = vmul.f32 %v4496_v19, %v2537_v57  ;;  %v2538_v34 = vmax.f32 %v2490_v18, 0.0  ;;  %v2112_v63 = vadd.f32 %v2111_v13, %v4370_v62  ;;  %v2492_v2 = vadd.f32 %v4475_v5, %v2110_v53  ;;  %2926 = vmatprep.mubr.f32.mxu1 %v2805_v14 }
 0x174   :  { %v2113_v10 = vpop.f32.mrf.mxu0  ;;  %v4521_v0 = vadd.f32 %v3205_v59, %v3204_v17  ;;  %v3207_v62 = vpop.f32.mrf.mxu1  ;;  %v2017_v13 = vadd.f32 %v4392_v30, %v4384_v54  ;;  %v4544_v53 = vadd.f32 %v4402_v35, %v4394_v31  ;;  %v4548_v54 = vadd.f32 %v4406_v36, %v4400_v33 }
 0x175   :  { %v2636_v12 = vmax.f32 %v2588_v24, %v2591_v4  ;;  %v2592_v57 = vmul.f32 %v4511_v6, %v2538_v34  ;;  %v2493_v18 = vadd.f32 %v4478_v11, %v2112_v63  ;;  %v2114_v37 = vadd.f32 %v2113_v10, %v4372_v9 }
 0x176   :  { %v2115_v55 = vpop.f32.mrf.mxu0  ;;  %v3208_v30 = vpop.f32.mrf.mxu1  ;;  %v2540_v9 = vmax.f32 %v2492_v2, 0.0  ;;  %v4560_v31 = vadd.f32 %v4414_v42, %v4408_v38  ;;  %v4565_v40 = vadd.f32 %v4418_v45, %v4412_v41  ;;  %v4574_v38 = vadd.f32 %v4426_v56, %v4420_v46 }
 0x177   :  { %v2643_v27 = vmax.f32 %v2589_v28, %v2592_v57  ;;  %v2495_v32 = vadd.f32 %v4475_v5, %v2114_v37  ;;  %v2116_v16 = vadd.f32 %v2115_v55, %v4374_v8  ;;  %v4556_v17 = vadd.f32 %v3208_v30, %v3207_v62 }
 0x178   :  { %v2119_v10 = vpop.f32.mrf.mxu0  ;;  %v2637_v33 = vrot.slane %v2636_v12, 4  ;;  %v2541_v35 = vmax.f32 %v2493_v18, 0.0  ;;  %v3210_v36 = vpop.f32.mrf.mxu1  ;;  %v4569_v28 = vadd.f32 %v4422_v7, %v4416_v44  ;;  %v2594_v44 = vmul.f32 %v4491_v49, %v2540_v9 }
 0x179   :  { %v2120_v3 = vadd.f32 %v2119_v10, %v4376_v20  ;;  %v2543_v8 = vmax.f32 %v2495_v32, 0.0  ;;  %v2496_v2 = vadd.f32 %v4478_v11, %v2116_v16  ;;  %v4578_v20 = vadd.f32 %v4428_v48, %v4424_v15  ;;  %v4905_v10 = vld [vmem:[#allocation7_spill] sm:$0xff] }
 0x17a   :  { %v2121_v24 = vpop.f32.mrf.mxu0  ;;  %v3211_v45 = vpop.f32.mrf.mxu1  ;;  %v4588_v46 = vadd.f32 %v4432_v39, %v4430_v60  ;;  %v2638_v56 = vmax.f32 %v2636_v12, %v2637_v33  ;;  %v2644_v15 = vrot.slane %v2643_v27, 4  ;;  %v2595_v48 = vmul.f32 %v4506_v22, %v2541_v35 }
 0x17b   :  { %v2498_v42 = vadd.f32 %v4475_v5, %v2120_v3  ;;  %v2122_v41 = vadd.f32 %v2121_v24, %v4380_v21  ;;  %v2597_v7 = vmul.f32 %v4496_v19, %v2543_v8  ;;  %v2544_v4 = vmax.f32 %v2496_v2, 0.0  ;;  %v4907_v2 = vld [vmem:[#allocation10_spill] sm:$0xff]  ;;  %v4908_v24 = vld [vmem:[#allocation11_spill] sm:$0xff] }
 0x17c   :  { %v2123_v34 = vpop.f32.mrf.mxu0  ;;  %v4584_v63 = vadd.f32 %v3211_v45, %v3210_v36  ;;  %v3213_v59 = vpop.f32.mrf.mxu1  ;;  %v4596_v55 = vadd.f32 %v4438_v58, %v4434_v43  ;;  %v4600_v60 = vadd.f32 %v4440_v1, %v4436_v50  ;;  %v4604_v39 = vadd.f32 %v4444_v51, %v4442_v47  ;;  %v4906_v43 = vld [vmem:[#allocation8_spill] sm:$0xff] }
 0x17d   :  { %v2657_v57 = vmax.f32 %v2594_v44, %v2597_v7  ;;  %v2598_v21 = vmul.f32 %v4511_v6, %v2544_v4  ;;  %v2499_v18 = vadd.f32 %v4478_v11, %v2122_v41  ;;  %v2124_v62 = vadd.f32 %v2123_v34, %v4382_v23 }
 0x17e   :  { %v2125_v37 = vpop.f32.mrf.mxu0  ;;  %v2546_v12 = vmax.f32 %v2498_v42, 0.0  ;;  %v3214_v14 = vpop.f32.mrf.mxu1  ;;  %v4610_v58 = vadd.f32 %v4906_v43, %v4905_v10  ;;  %v2639_v33 = vrot.slane %v2638_v56, 2  ;;  %v2645_v50 = vmax.f32 %v2643_v27, %v2644_v15 }
 0x17f   :  { %v2658_v30 = vrot.slane %v2657_v57, 4  ;;  %v2664_v9 = vmax.f32 %v2595_v48, %v2598_v21  ;;  %v2501_v32 = vadd.f32 %v4475_v5, %v2124_v62  ;;  %v2126_v23 = vadd.f32 %v2125_v37, %v4518_v61 }
 0x180   :  { %v2129_v16 = vpop.f32.mrf.mxu0  ;;  %v4612_v35 = vpop.f32.mrf.mxu1  ;;  %v2547_v51 = vmax.f32 %v2499_v18, 0.0  ;;  %v4617_v42 = vadd.f32 %v4908_v24, %v4907_v2  ;;  %v4621_v45 = vadd.f32 %v3214_v14, %v3213_v59  ;;  %v2600_v44 = vmul.f32 %v4491_v49, %v2546_v12  ;;  %v3002_v12 = vld [vmem:[#allocation3] sm:$0x1] }
 0x181   :  { %v2130_v1 = vadd.f32 %v2129_v16, %v2017_v13  ;;  %v2665_v47 = vrot.slane %v2664_v9, 4  ;;  %v2549_v3 = vmax.f32 %v2501_v32, 0.0  ;;  %v2502_v36 = vadd.f32 %v4478_v11, %v2126_v23  ;;  %v4910_v32 = vld [vmem:[#allocation13_spill] sm:$0xff]  ;;  %3005 = vperm.xlu0 %3371, %v3002_v12  }
 0x182   :  { %v2131_v8 = vpop.f32.mrf.mxu0  ;;  %v4623_v27 = vpop.f32.mrf.mxu1  ;;  %v2659_v13 = vmax.f32 %v2657_v57, %v2658_v30  ;;  %v2640_v15 = vmax.f32 %v2638_v56, %v2639_v33  ;;  %v2646_v48 = vrot.slane %v2645_v50, 2  ;;  %v2601_v59 = vmul.f32 %v4506_v22, %v2547_v51  ;;  %v4909_v30 = vld [vmem:[#allocation12_spill] sm:$0xff] }
 0x183   :  { %v2504_v61 = vadd.f32 %v4475_v5, %v2130_v1  ;;  %v2132_v41 = vadd.f32 %v2131_v8, %v4532_v52  ;;  %v2603_v7 = vmul.f32 %v4496_v19, %v2549_v3  ;;  %v2550_v4 = vmax.f32 %v2502_v36, 0.0 }
 0x184   :  { %v2133_v34 = vpop.f32.mrf.mxu0  ;;  %v4629_v62 = vpop.f32.mrf.mxu1  ;;  %v2666_v52 = vmax.f32 %v2664_v9, %v2665_v47  ;;  %v4635_v23 = vadd.f32 %v4910_v32, %v4909_v30  ;;  %v2660_v9 = vrot.slane %v2659_v13, 2  ;;  %v2641_v51 = vrot.slane %v2640_v15, 1 }
 0x185   :  { %v2505_v21 = vadd.f32 %v4478_v11, %v2132_v41  ;;  %v2134_v18 = vadd.f32 %v2133_v34, %v4536_v25  ;;  %v2678_v37 = vmax.f32 %v2600_v44, %v2603_v7  ;;  %v2604_v57 = vmul.f32 %v4511_v6, %v2550_v4 }
 0x186   :  { %v2135_v14 = vpop.f32.mrf.mxu0  ;;  %v2552_v56 = vmax.f32 %v2504_v61, 0.0  ;;  %v4639_v25 = vpop.f32.mrf.mxu1  ;;  %v2647_v24 = vmax.f32 %v2645_v50, %v2646_v48  ;;  %v2667_v61 = vrot.slane %v2666_v52, 2 }
 0x187   :  { %v2507_v16 = vadd.f32 %v4475_v5, %v2134_v18  ;;  %v2136_v10 = vadd.f32 %v2135_v14, %v4544_v53  ;;  %v2679_v43 = vrot.slane %v2678_v37, 4  ;;  %v2685_v33 = vmax.f32 %v2601_v59, %v2604_v57  ;;  %v4911_v59 = vld [vmem:[#allocation14_spill] sm:$0xff]  ;;  %v4912_v57 = vld [vmem:[#allocation15_spill] sm:$0xff] }
 0x188   :  { %v2553_v1 = vmax.f32 %v2505_v21, 0.0  ;;  %v2139_v47 = vpop.f32.mrf.mxu0  ;;  %v4643_v2 = vpop.f32.mrf.mxu1  ;;  %v2606_v7 = vmul.f32 %v4491_v49, %v2552_v56  ;;  %v4652_v14 = vadd.f32 %v4912_v57, %v4911_v59 }
 0x189   :  { %v2555_v3 = vmax.f32 %v2507_v16, 0.0  ;;  %v2508_v36 = vadd.f32 %v4478_v11, %v2136_v10  ;;  %v2140_v8 = vadd.f32 %v2139_v47, %v4548_v54  ;;  %v2680_v41 = vmax.f32 %v2678_v37, %v2679_v43  ;;  %v4914_v10 = vld [vmem:[#allocation17_spill] sm:$0xff] }
 0x18a   :  { %v2686_v53 = vrot.slane %v2685_v33, 4  ;;  %v2141_v44 = vpop.f32.mrf.mxu0  ;;  %v4648_v18 = vpop.f32.mrf.mxu1  ;;  %v2661_v54 = vmax.f32 %v2659_v13, %v2660_v9  ;;  %v2607_v50 = vmul.f32 %v4506_v22, %v2553_v1  ;;  %v2668_v47 = vmax.f32 %v2666_v52, %v2667_v61 }
 0x18b   :  { %v2609_v4 = vmul.f32 %v4496_v19, %v2555_v3  ;;  %v2556_v34 = vmax.f32 %v2508_v36, 0.0  ;;  %v2142_v21 = vadd.f32 %v2141_v44, %v4552_v26  ;;  %v2510_v48 = vadd.f32 %v4475_v5, %v2140_v8  ;;  %v4913_v26 = vld [vmem:[#allocation16_spill] sm:$0xff] }
 0x18c   :  { %v2143_v37 = vpop.f32.mrf.mxu0  ;;  %v2681_v12 = vrot.slane %v2680_v41, 2  ;;  %v2687_v30 = vmax.f32 %v2685_v33, %v2686_v53  ;;  %v4657_v16 = vpop.f32.mrf.mxu1  ;;  %v4661_v43 = vadd.f32 %v4914_v10, %v4913_v26  ;;  %v4665_v1 = vmax.f32 %v2640_v15, %v2641_v51 }
 0x18d   :  { %v2699_v32 = vmax.f32 %v2606_v7, %v2609_v4  ;;  %v2610_v56 = vmul.f32 %v4511_v6, %v2556_v34  ;;  %v2511_v3 = vadd.f32 %v4478_v11, %v2142_v21  ;;  %v2144_v13 = vadd.f32 %v2143_v37, %v4560_v31 }
 0x18e   :  { %v2145_v9 = vpop.f32.mrf.mxu0  ;;  %v2648_v36 = vrot.slane %v2647_v24, 1  ;;  %v4667_v53 = vpop.f32.mrf.mxu1  ;;  %v2662_v44 = vrot.slane %v2661_v54, 1  ;;  %v2558_v7 = vmax.f32 %v2510_v48, 0.0  ;;  %v2682_v52 = vmax.f32 %v2680_v41, %v2681_v12 }
 0x18f   :  { %v2700_v8 = vrot.slane %v2699_v32, 4  ;;  %v2706_v33 = vmax.f32 %v2607_v50, %v2610_v56  ;;  %v2513_v4 = vadd.f32 %v4475_v5, %v2144_v13  ;;  %v2146_v34 = vadd.f32 %v2145_v9, %v4565_v40 }
 0x190   :  { %v2149_v59 = vpop.f32.mrf.mxu0  ;;  %v2688_v61 = vrot.slane %v2687_v30, 2  ;;  %v4672_v57 = vpop.f32.mrf.mxu1  ;;  %v2669_v15 = vrot.slane %v2668_v47, 1  ;;  %v2559_v51 = vmax.f32 %v2511_v3, 0.0  ;;  %v4679_v41 = vmax.f32 %v2647_v24, %v2648_v36 }
 0x191   :  { %v2707_v21 = vrot.slane %v2706_v33, 4  ;;  %v2150_v31 = vadd.f32 %v2149_v59, %v4569_v28  ;;  %v2561_v37 = vmax.f32 %v2513_v4, 0.0  ;;  %v2514_v50 = vadd.f32 %v4478_v11, %v2146_v34 }
 0x192   :  { %v2151_v56 = vpop.f32.mrf.mxu0  ;;  %v2701_v26 = vmax.f32 %v2699_v32, %v2700_v8  ;;  %v4677_v13 = vpop.f32.mrf.mxu1  ;;  %v2612_v28 = vmul.f32 %v4491_v49, %v2558_v7  ;;  %v4683_v4 = vmax.f32 %v2661_v54, %v2662_v44  ;;  %v2683_v34 = vrot.slane %v2682_v52, 1 }
 0x193   :  { %v2708_v48 = vmax.f32 %v2706_v33, %v2707_v21  ;;  %v2516_v10 = vadd.f32 %v4475_v5, %v2150_v31  ;;  %v2152_v40 = vadd.f32 %v2151_v56, %v4574_v38  ;;  %v2615_v12 = vmul.f32 %v4496_v19, %v2561_v37 }
 0x194   :  { %v2562_v9 = vmax.f32 %v2514_v50, 0.0  ;;  %v2153_v3 = vpop.f32.mrf.mxu0  ;;  %v2689_v59 = vmax.f32 %v2687_v30, %v2688_v61  ;;  %v4686_v8 = vpop.f32.mrf.mxu1  ;;  %v2613_v38 = vmul.f32 %v4506_v22, %v2559_v51  ;;  %v4691_v21 = vmax.f32 %v2668_v47, %v2669_v15 }
 0x195   :  { %v2517_v32 = vadd.f32 %v4478_v11, %v2152_v40  ;;  %v2720_v33 = vmax.f32 %v2612_v28, %v2615_v12  ;;  %v2154_v36 = vadd.f32 %v2153_v3, %v4578_v20  ;;  %v2702_v31 = vrot.slane %v2701_v26, 2 }
 0x196   :  { %v2616_v24 = vmul.f32 %v4511_v6, %v2562_v9  ;;  %v2155_v7 = vpop.f32.mrf.mxu0  ;;  %v2709_v37 = vrot.slane %v2708_v48, 2  ;;  %v2564_v54 = vmax.f32 %v2516_v10, 0.0  ;;  %v4693_v44 = vpop.f32.mrf.mxu1  ;;  %v4697_v40 = vmax.f32 %v2682_v52, %v2683_v34 }
 0x197   :  { %4915 = vst [vmem:[#allocation7_spill] sm:$0xff] %v4693_v44  ;;  %v2721_v30 = vrot.slane %v2720_v33, 4  ;;  %v2519_v50 = vadd.f32 %v4475_v5, %v2154_v36  ;;  %v2156_v56 = vadd.f32 %v2155_v7, %v4588_v46  ;;  %v2690_v28 = vrot.slane %v2689_v59, 1 }
 0x198   :  { %v2727_v61 = vmax.f32 %v2613_v38, %v2616_v24  ;;  %v2159_v51 = vpop.f32.mrf.mxu0  ;;  %v2565_v12 = vmax.f32 %v2517_v32, 0.0  ;;  %v4700_v47 = vpop.f32.mrf.mxu1  ;;  %v2703_v38 = vmax.f32 %v2701_v26, %v2702_v31  ;;  %v2710_v24 = vmax.f32 %v2708_v48, %v2709_v37 }
 0x199   :  { %v2160_v20 = vadd.f32 %v2159_v51, %v4596_v55  ;;  %v2722_v15 = vmax.f32 %v2720_v33, %v2721_v30  ;;  %v2567_v10 = vmax.f32 %v2519_v50, 0.0  ;;  %v2520_v3 = vadd.f32 %v4478_v11, %v2156_v56 }
 0x19a   :  { %v2728_v9 = vrot.slane %v2727_v61, 4  ;;  %v2161_v44 = vpop.f32.mrf.mxu0  ;;  %v4705_v52 = vpop.f32.mrf.mxu1  ;;  %v2618_v32 = vmul.f32 %v4491_v49, %v2564_v54  ;;  %v2619_v50 = vmul.f32 %v4506_v22, %v2565_v12  ;;  %v4715_v54 = vmax.f32 %v2689_v59, %v2690_v28 }
 0x19b   :  { %v2522_v36 = vadd.f32 %v4475_v5, %v2160_v20  ;;  %v2162_v46 = vadd.f32 %v2161_v44, %v4600_v60  ;;  %v2621_v55 = vmul.f32 %v4496_v19, %v2567_v10  ;;  %v2568_v7 = vmax.f32 %v2520_v3, 0.0 }
 0x19c   :  { %v2729_v34 = vmax.f32 %v2727_v61, %v2728_v9  ;;  %v2163_v33 = vpop.f32.mrf.mxu0  ;;  %v2723_v30 = vrot.slane %v2722_v15, 2  ;;  %v4712_v48 = vpop.f32.mrf.mxu1  ;;  %v2704_v51 = vrot.slane %v2703_v38, 1 }
 0x19d   :  { %v2523_v56 = vadd.f32 %v4478_v11, %v2162_v46  ;;  %v2164_v26 = vadd.f32 %v2163_v33, %v4604_v39  ;;  %4916 = vst [vmem:[#allocation8_spill] sm:$0xff] %v4712_v48  ;;  %v2741_v60 = vmax.f32 %v2618_v32, %v2621_v55  ;;  %v2622_v37 = vmul.f32 %v4511_v6, %v2568_v7 }
 0x19e   :  { %v2730_v31 = vrot.slane %v2729_v34, 2  ;;  %v2570_v44 = vmax.f32 %v2522_v36, 0.0  ;;  %v2165_v61 = vpop.f32.mrf.mxu0  ;;  %v4719_v12 = vpop.f32.mrf.mxu1  ;;  %v2711_v48 = vrot.slane %v2710_v24, 1  ;;  %v4725_v28 = vmax.f32 %v2722_v15, %v2723_v30 }
 0x19f   :  { %v2525_v20 = vadd.f32 %v4475_v5, %v2164_v26  ;;  %v2166_v9 = vadd.f32 %v2165_v61, %v4610_v58  ;;  %v2742_v3 = vrot.slane %v2741_v60, 4  ;;  %v2748_v39 = vmax.f32 %v2619_v50, %v2622_v37 }
 0x1a0   :  { %v2731_v10 = vmax.f32 %v2729_v34, %v2730_v31  ;;  %v2571_v46 = vmax.f32 %v2523_v56, 0.0  ;;  %v2169_v33 = vpop.f32.mrf.mxu0  ;;  %v4723_v59 = vpop.f32.mrf.mxu1  ;;  %v2624_v26 = vmul.f32 %v4491_v49, %v2570_v44 }
 0x1a1   :  { %v2573_v32 = vmax.f32 %v2525_v20, 0.0  ;;  %v2526_v55 = vadd.f32 %v4478_v11, %v2166_v9  ;;  %v2170_v36 = vadd.f32 %v2169_v33, %v4617_v42  ;;  %4917 = vst [vmem:[#allocation10_spill] sm:$0xff] %v4723_v59  ;;  %v2743_v7 = vmax.f32 %v2741_v60, %v2742_v3 }
 0x1a2   :  { %v2749_v58 = vrot.slane %v2748_v39, 4  ;;  %v2171_v34 = vpop.f32.mrf.mxu0  ;;  %v4731_v61 = vpop.f32.mrf.mxu1  ;;  %v2732_v42 = vrot.slane %v2731_v10, 1  ;;  %v2625_v30 = vmul.f32 %v4506_v22, %v2571_v46  ;;  %v2725_v46 = vrot.slane %v4725_v28, 1 }
 0x1a3   :  { %v2627_v50 = vmul.f32 %v4496_v19, %v2573_v32  ;;  %v2574_v56 = vmax.f32 %v2526_v55, 0.0  ;;  %v2528_v31 = vadd.f32 %v4475_v5, %v2170_v36  ;;  %v2172_v37 = vadd.f32 %v2171_v34, %v4635_v23  ;;  %4918 = vst [vmem:[#allocation11_spill] sm:$0xff] %v4731_v61 }
 0x1a4   :  { %v2744_v20 = vrot.slane %v2743_v7, 2  ;;  %v2750_v15 = vmax.f32 %v2748_v39, %v2749_v58  ;;  %v2173_v60 = vpop.f32.mrf.mxu0  ;;  %v4736_v32 = vpop.f32.mrf.mxu1  ;;  %v4738_v23 = vmax.f32 %v2703_v38, %v2704_v51  ;;  %v2712_v55 = vmax.f32 %v2710_v24, %v2711_v48 }
 0x1a5   :  { %v2762_v44 = vmax.f32 %v2624_v26, %v2627_v50  ;;  %v2628_v9 = vmul.f32 %v4511_v6, %v2574_v56  ;;  %v2576_v3 = vmax.f32 %v2528_v31, 0.0  ;;  %v2529_v33 = vadd.f32 %v4478_v11, %v2172_v37  ;;  %4919 = vst [vmem:[#allocation12_spill] sm:$0xff] %v4736_v32 }
 0x1a6   :  { %v2751_v36 = vrot.slane %v2750_v15, 2  ;;  %v2174_v34 = vadd.f32 %v2173_v60, %v4652_v14  ;;  %v2175_v39 = vpop.f32.mrf.mxu0  ;;  %v2745_v58 = vmax.f32 %v2743_v7, %v2744_v20  ;;  %v4742_v50 = vpop.f32.mrf.mxu1  ;;  %v2733_v38 = vmax.f32 %v2731_v10, %v2732_v42 }
 0x1a7   :  { %v2763_v61 = vrot.slane %v2762_v44, 4  ;;  %v2769_v26 = vmax.f32 %v2625_v30, %v2628_v9  ;;  %v2176_v37 = vadd.f32 %v2175_v39, %v4661_v43  ;;  %v2630_v48 = vmul.f32 %v4491_v49, %v2576_v3 }
 0x1a8   :  { %v2752_v56 = vmax.f32 %v2750_v15, %v2751_v36  ;;  %v2531_v31 = vadd.f32 %v4475_v5, %v2174_v34  ;;  %v3262_v32 = vpop.f32.mrf.mxu0  ;;  %v2577_v14 = vmax.f32 %v2529_v33, 0.0  ;;  %v4747_v60 = vpop.f32.mrf.mxu1  ;;  %v2845_v5 = vsel %vm2831_vm0, %v4691_v21, %v4679_v41  ;;  %v4920_v34 = vld [vmem:[#allocation18_spill] sm:$0xff] }
 0x1a9   :  { %v2764_v51 = vmax.f32 %v2762_v44, %v2763_v61  ;;  %v2770_v24 = vrot.slane %v2769_v26, 4  ;;  %v2532_v7 = vadd.f32 %v4478_v11, %v2176_v37  ;;  %v2846_v61 = vsel %vm2833_vm2, %v4715_v54, %v2845_v5 }
 0x1aa   :  { %v2579_v59 = vmax.f32 %v2531_v31, 0.0  ;;  %v3263_v20 = vpop.f32.mrf.mxu0  ;;  %v2753_v30 = vrot.slane %v2752_v56, 1  ;;  %v2406_v10 = vpop.f32.mrf.mxu1  ;;  %v2847_v11 = vsel %vm2835_vm3, %v2712_v55, %v2846_v61  ;;  %v2631_v21 = vmul.f32 %v4506_v22, %v2577_v14 }
 0x1ab   :  { %v2765_v15 = vrot.slane %v2764_v51, 2  ;;  %v2771_v43 = vmax.f32 %v2769_v26, %v2770_v24  ;;  %v3264_v9 = vadd.f32 %v3263_v20, %v3262_v32  ;;  %v2580_v42 = vmax.f32 %v2532_v7, 0.0 }
 0x1ac   :  { %v2633_v49 = vmul.f32 %v4496_v19, %v2579_v59  ;;  %v3265_v44 = vpop.f32.mrf.mxu0  ;;  %v2754_v3 = vmax.f32 %v2752_v56, %v2753_v30  ;;  %v4758_v31 = vpop.f32.mrf.mxu1  ;;  %v2848_v41 = vsel %vm2837_vm4, %v2733_v38, %v2847_v11  ;;  %v2746_v59 = vrot.slane %v2745_v58, 1 }
 0x1ad   :  { %v2766_v33 = vmax.f32 %v2764_v51, %v2765_v15  ;;  %v2772_v36 = vrot.slane %v2771_v43, 2  ;;  %v2310_v39 = vadd.f32 %v3264_v9, %v4920_v34  ;;  %v2634_v54 = vmul.f32 %v4511_v6, %v2580_v42 }
 0x1ae   :  { %v2783_v32 = vmax.f32 %v2630_v48, %v2633_v49  ;;  %v3266_v26 = vpop.f32.mrf.mxu0  ;;  %v2849_v19 = vsel %vm2839_vm5, %v2754_v3, %v2848_v41  ;;  %v2409_v20 = vpop.f32.mrf.mxu1  ;;  %v2832_v38 = vsel %vm2831_vm0, %v4683_v4, %v4665_v1  ;;  %v4921_v48 = vld [vmem:[#allocation19_spill] sm:$0xff]  ;;  %v2726_v5 = vmax.f32 %v4725_v28, %v2725_v46 }
 0x1af   :  { %v3267_v56 = vadd.f32 %v3266_v26, %v3265_v44  ;;  %v2407_v37 = vadd.f32 %v2406_v10, %v2310_v39  ;;  %v2773_v55 = vmax.f32 %v2771_v43, %v2772_v36  ;;  %v2790_v24 = vmax.f32 %v2631_v21, %v2634_v54 }
 0x1b0   :  { %v2784_v51 = vrot.slane %v2783_v32, 4  ;;  %v3268_v7 = vpop.f32.mrf.mxu0  ;;  %v2767_v30 = vrot.slane %v2766_v33, 1  ;;  %v2834_v10 = vsel %vm2833_vm2, %v4697_v40, %v2832_v38  ;;  %v2747_v44 = vmax.f32 %v2745_v58, %v2746_v59  ;;  %v4776_v39 = vpop.f32.mrf.mxu1  ;;  %v4782_v58 = vld [vmem:[%s4874_s3 + $0x10] sm:$0xff] }
 0x1b1   :  { %v2488_v22 = vadd.f32 %v4523_v29, %v2407_v37  ;;  %v2313_v6 = vadd.f32 %v3267_v56, %v4921_v48  ;;  %v2774_v14 = vrot.slane %v2773_v55, 1  ;;  %v2791_v9 = vrot.slane %v2790_v24, 4 }
 0x1b2   :  { %v2785_v15 = vmax.f32 %v2783_v32, %v2784_v51  ;;  %v3269_v43 = vpop.f32.mrf.mxu0  ;;  %v2768_v11 = vmax.f32 %v2766_v33, %v2767_v30  ;;  %v2836_v36 = vsel %vm2835_vm3, %v4738_v23, %v2834_v10  ;;  %v4787_v33 = vld [vmem:[%s4874_s3 + $0x28] sm:$0xff]  ;;  %v2422_v30 = vpop.f32.mrf.mxu1 }
 0x1b3   :  { %v3270_v61 = vadd.f32 %v3269_v43, %v3268_v7  ;;  %v2410_v49 = vadd.f32 %v2409_v20, %v2313_v6  ;;  %v2775_v42 = vmax.f32 %v2773_v55, %v2774_v14  ;;  %v2792_v1 = vmax.f32 %v2790_v24, %v2791_v9 }
 0x1b4   :  { %v2786_v3 = vrot.slane %v2785_v15, 2  ;;  %v3271_v4 = vpop.f32.mrf.mxu0  ;;  %v2536_v34 = vmax.f32 %v2488_v22, 0.0 }
 0x1b5   :  { %v2318_v28 = vadd.f32 %v3270_v61, %v4521_v0  ;;  %v2491_v46 = vadd.f32 %v4523_v29, %v2410_v49  ;;  %v2850_v40 = vsel %vm2841_vm6, %v2775_v42, %v2849_v19  ;;  %v2793_v41 = vrot.slane %v2792_v1, 2  ;;  %v3351_v42 = vpop.f32.mrf.mxu1 }
 0x1b6   :  { %v3272_v23 = vpop.f32.mrf.mxu0  ;;  %v2787_v21 = vmax.f32 %v2785_v15, %v2786_v3  ;;  %v2838_v0 = vsel %vm2837_vm4, %v2726_v5, %v2836_v36  ;;  %v2590_v51 = vmul.f32 %v4782_v58, %v2536_v34  ;;  %v2804_v36 = vld [vmem:[%s4875_s4] sm:$0xff] }
 0x1b7   :  { %v2415_v32 = vadd.f32 %v4747_v60, %v2318_v28  ;;  %v2539_v54 = vmax.f32 %v2491_v46, 0.0  ;;  %v3273_v26 = vadd.f32 %v3272_v23, %v3271_v4  ;;  %v2840_v19 = vsel %vm2839_vm5, %v2747_v44, %v2838_v0  ;;  %v2425_v46 = vpop.f32.mrf.mxu1 }
 0x1b8   :  { %v3274_v59 = vpop.f32.mrf.mxu0  ;;  %v2794_v56 = vmax.f32 %v2792_v1, %v2793_v41  ;;  %v2788_v37 = vrot.slane %v2787_v21, 1  ;;  %v2842_v55 = vsel %vm2841_vm6, %v2768_v11, %v2840_v19  ;;  %v3616_v23 = vmov 0.0  }
 0x1b9   :  { %v2494_v24 = vadd.f32 %v4523_v29, %v2415_v32  ;;  %v2593_v7 = vmul.f32 %v4787_v33, %v2539_v54  ;;  %v2321_v20 = vadd.f32 %v3273_v26, %v4556_v17  ;;  %v3218_v0 = vadd.f32 %v4623_v27, %v4612_v35 }
 0x1ba   :  { %v3275_v60 = vpop.f32.mrf.mxu0  ;;  %v2795_v38 = vrot.slane %v2794_v56, 1  ;;  %v2789_v22 = vmax.f32 %v2787_v21, %v2788_v37 }
 0x1bb   :  { %v2650_v48 = vmax.f32 %v2590_v51, %v2593_v7  ;;  %v2418_v6 = vadd.f32 %v4758_v31, %v2321_v20  ;;  %v3276_v14 = vadd.f32 %v3275_v60, %v3274_v59  ;;  %v2542_v43 = vmax.f32 %v2494_v24, 0.0  ;;  %v4811_v59 = vpop.f32.mrf.mxu1 }
 0x1bc   :  { %v3277_v5 = vpop.f32.mrf.mxu0  ;;  %v2796_v15 = vmax.f32 %v2794_v56, %v2795_v38  ;;  %v2844_v9 = vsel %vm2843_vm7, %v2789_v22, %v2842_v55  ;;  %v3221_v7 = vadd.f32 %v4639_v25, %v4629_v62  ;;  %v3224_v62 = vadd.f32 %v4648_v18, %v4643_v2 }
 0x1bd   :  { %v2651_v10 = vrot.slane %v2650_v48, 4  ;;  %v2497_v61 = vadd.f32 %v4523_v29, %v2418_v6  ;;  %v2326_v49 = vadd.f32 %v3276_v14, %v4584_v63  ;;  %v2596_v34 = vmul.f32 %v4782_v58, %v2542_v43  ;;  %v2438_v38 = vpop.f32.mrf.mxu1 }
 0x1be   :  { %v3278_v17 = vpop.f32.mrf.mxu0  ;;  %v2851_v44 = vsel %vm2843_vm7, %v2796_v15, %v2850_v40 }
 0x1bf   :  { %v2652_v3 = vmax.f32 %v2650_v48, %v2651_v10  ;;  %v2545_v1 = vmax.f32 %v2497_v61, 0.0  ;;  %v3279_v4 = vadd.f32 %v3278_v17, %v3277_v5  ;;  %v2423_v11 = vadd.f32 %v2422_v30, %v2326_v49  ;;  %2892 = vmatprep.subr.mxu1 %v2851_v44  ;;  %v3355_v17 = vpop.f32.mrf.mxu1 }
 0x1c0   :  { %2893 = vmatpush1.xpose.msra.mxu1 %v2844_v9  ;;  %v3280_v31 = vpop.f32.mrf.mxu0 }
 0x1c1   :  { %v2599_v28 = vmul.f32 %v4787_v33, %v2545_v1  ;;  %v2329_v63 = vadd.f32 %v3279_v4, %v4621_v45  ;;  %3360 = vmatprep.subr.mxu1 %v3616_v23  ;;  %v2653_v40 = vrot.slane %v2652_v3, 2  ;;  %v2500_v41 = vadd.f32 %v4523_v29, %v2423_v11 }
 0x1c2   :  { %v3281_v21 = vpop.f32.mrf.mxu0  ;;  %v3227_v4 = vadd.f32 %v4667_v53, %v4657_v16 }
 0x1c3   :  { %v2671_v32 = vmax.f32 %v2596_v34, %v2599_v28  ;;  %v3282_v54 = vadd.f32 %v3281_v21, %v3280_v31  ;;  %2927 = vmatmul.mubr.f32.vlgmr.msra.gmra.mxu1 %v2804_v36  ;;  %v2426_v26 = vadd.f32 %v2425_v46, %v2329_v63  ;;  %v2654_v37 = vmax.f32 %v2652_v3, %v2653_v40 }
 0x1c4   :  { %v3283_v19 = vpop.f32.mrf.mxu0  ;;  %3362 = vmatprep.mubr.msk.f32.mxu1 %vm3617_vm8, %v3616_v23  ;;  %v2548_v55 = vmax.f32 %v2500_v41, 0.0  ;;  %v2441_v23 = vpop.f32.mrf.mxu1 }
 0x1c5   :  { %v2672_v45 = vrot.slane %v2671_v32, 4  ;;  %v2334_v56 = vadd.f32 %v3282_v54, %v3218_v0  ;;  %v2503_v51 = vadd.f32 %v4523_v29, %v2426_v26  ;;  %v2655_v14 = vrot.slane %v2654_v37, 1 }
 0x1c6   :  { %v3284_v24 = vpop.f32.mrf.mxu0  ;;  %v2602_v5 = vmul.f32 %v4782_v58, %v2548_v55 }
 0x1c7   :  { %v2673_v35 = vmax.f32 %v2671_v32, %v2672_v45  ;;  %v2431_v27 = vadd.f32 %v4776_v39, %v2334_v56  ;;  %v3285_v20 = vadd.f32 %v3284_v24, %v3283_v19  ;;  %v2551_v30 = vmax.f32 %v2503_v51, 0.0 }
 0x1c8   :  { %v3286_v60 = vpop.f32.mrf.mxu0  ;;  %v2656_v11 = vmax.f32 %v2654_v37, %v2655_v14  ;;  %v3230_v32 = vadd.f32 %v4677_v13, %v4672_v57  ;;  %v3358_v37 = vpop.f32.mrf.mxu1 }
 0x1c9   :  { %v2674_v22 = vrot.slane %v2673_v35, 2  ;;  %v2506_v48 = vadd.f32 %v4523_v29, %v2431_v27  ;;  %v2337_v6 = vadd.f32 %v3285_v20, %v3221_v7  ;;  %v2605_v15 = vmul.f32 %v4787_v33, %v2551_v30 }
 0x1ca   :  { %v3287_v9 = vpop.f32.mrf.mxu0 }
 0x1cb   :  { %v2675_v25 = vmax.f32 %v2673_v35, %v2674_v22  ;;  %v2434_v43 = vadd.f32 %v3351_v42, %v2337_v6  ;;  %v3288_v39 = vadd.f32 %v3287_v9, %v3286_v60  ;;  %v2554_v10 = vmax.f32 %v2506_v48, 0.0  ;;  %v4922_v35 = vld [vmem:[#allocation7_spill] sm:$0xff]  ;;  %v2454_v6 = vpop.f32.mrf.mxu1 }
 0x1cc   :  { %v2692_v61 = vmax.f32 %v2602_v5, %v2605_v15  ;;  %v3289_v49 = vpop.f32.mrf.mxu0  ;;  %v3233_v27 = vadd.f32 %v4922_v35, %v4686_v8 }
 0x1cd   :  { %v2676_v44 = vrot.slane %v2675_v25, 1  ;;  %v2509_v3 = vadd.f32 %v4523_v29, %v2434_v43  ;;  %v2342_v1 = vadd.f32 %v3288_v39, %v3224_v62  ;;  %v2608_v42 = vmul.f32 %v4782_v58, %v2554_v10 }
 0x1ce   :  { %v2693_v31 = vrot.slane %v2692_v61, 4  ;;  %v3290_v36 = vpop.f32.mrf.mxu0 }
 0x1cf   :  { %v2677_v34 = vmax.f32 %v2675_v25, %v2676_v44  ;;  %v2557_v28 = vmax.f32 %v2509_v3, 0.0  ;;  %v3291_v2 = vadd.f32 %v3290_v36, %v3289_v49  ;;  %v2439_v18 = vadd.f32 %v2438_v38, %v2342_v1  ;;  %v3359_v44 = vpop.f32.mrf.mxu1 }
 0x1d0   :  { %v2694_v63 = vmax.f32 %v2692_v61, %v2693_v31  ;;  %v3292_v46 = vpop.f32.mrf.mxu0 }
 0x1d1   :  { %v2611_v40 = vmul.f32 %v4787_v33, %v2557_v28  ;;  %v2512_v41 = vadd.f32 %v4523_v29, %v2439_v18  ;;  %v2345_v21 = vadd.f32 %v3291_v2, %v3227_v4  ;;  %v2852_v0 = vsel %vm2831_vm0, %v2677_v34, %v2656_v11  ;;  %v4923_v11 = vld [vmem:[#allocation8_spill] sm:$0xff] }
 0x1d2   :  { %v2695_v16 = vrot.slane %v2694_v63, 2  ;;  %v3293_v53 = vpop.f32.mrf.mxu0  ;;  %v3239_v31 = vadd.f32 %v4719_v12, %v4923_v11 }
 0x1d3   :  { %v2713_v54 = vmax.f32 %v2608_v42, %v2611_v40  ;;  %v3294_v26 = vadd.f32 %v3293_v53, %v3292_v46  ;;  %v2442_v19 = vadd.f32 %v2441_v23, %v2345_v21  ;;  %v2560_v51 = vmax.f32 %v2512_v41, 0.0  ;;  %v4925_v53 = vld [vmem:[#allocation11_spill] sm:$0xff] }
 0x1d4   :  { %v2696_v45 = vmax.f32 %v2694_v63, %v2695_v16  ;;  %v3295_v56 = vpop.f32.mrf.mxu0  ;;  %v4924_v16 = vld [vmem:[#allocation10_spill] sm:$0xff] }
 0x1d5   :  { %v2714_v55 = vrot.slane %v2713_v54, 4  ;;  %v2350_v24 = vadd.f32 %v3294_v26, %v3230_v32  ;;  %v2515_v7 = vadd.f32 %v4523_v29, %v2442_v19  ;;  %v2614_v5 = vmul.f32 %v4782_v58, %v2560_v51 }
 0x1d6   :  { %v2697_v20 = vrot.slane %v2696_v45, 1  ;;  %v3296_v30 = vpop.f32.mrf.mxu0  ;;  %v3242_v32 = vadd.f32 %v4925_v53, %v4924_v16 }
 0x1d7   :  { %v2715_v60 = vmax.f32 %v2713_v54, %v2714_v55  ;;  %v2447_v38 = vadd.f32 %v4811_v59, %v2350_v24  ;;  %v2563_v57 = vmax.f32 %v2515_v7, 0.0  ;;  %v3297_v13 = vadd.f32 %v3296_v30, %v3295_v56 }
 0x1d8   :  { %v2698_v22 = vmax.f32 %v2696_v45, %v2697_v20  ;;  %v3298_v48 = vpop.f32.mrf.mxu0  ;;  %v3236_v59 = vadd.f32 %v4705_v52, %v4700_v47  ;;  %v2457_v47 = vpop.f32.mrf.mxu1 }
 0x1d9   :  { %v2716_v14 = vrot.slane %v2715_v60, 2  ;;  %v2617_v15 = vmul.f32 %v4787_v33, %v2563_v57  ;;  %v2353_v9 = vadd.f32 %v3297_v13, %v3233_v27  ;;  %v2518_v62 = vadd.f32 %v4523_v29, %v2447_v38 }
 0x1da   :  { %v3299_v25 = vpop.f32.mrf.mxu0  ;;  %v2853_v8 = vsel %vm2833_vm2, %v2698_v22, %v2852_v0 }
 0x1db   :  { %v2717_v43 = vmax.f32 %v2715_v60, %v2716_v14  ;;  %v2734_v39 = vmax.f32 %v2614_v5, %v2617_v15  ;;  %v2450_v10 = vadd.f32 %v3355_v17, %v2353_v9  ;;  %v3300_v61 = vadd.f32 %v3299_v25, %v3298_v48  ;;  %v4926_v60 = vld [vmem:[#allocation12_spill] sm:$0xff] }
 0x1dc   :  { %v3301_v49 = vpop.f32.mrf.mxu0  ;;  %v2566_v36 = vmax.f32 %v2518_v62, 0.0  ;;  %v3245_v38 = vadd.f32 %v4742_v50, %v4926_v60 }
 0x1dd   :  { %v2718_v3 = vrot.slane %v2717_v43, 1  ;;  %v2735_v1 = vrot.slane %v2734_v39, 4  ;;  %v2521_v4 = vadd.f32 %v4523_v29, %v2450_v10  ;;  %v2358_v28 = vadd.f32 %v3300_v61, %v3236_v59 }
 0x1de   :  { %v3302_v34 = vpop.f32.mrf.mxu0  ;;  %v2620_v21 = vmul.f32 %v4782_v58, %v2566_v36 }
 0x1df   :  { %v2736_v2 = vmax.f32 %v2734_v39, %v2735_v1  ;;  %v2569_v18 = vmax.f32 %v2521_v4, 0.0  ;;  %v3303_v42 = vadd.f32 %v3302_v34, %v3301_v49  ;;  %v2719_v17 = vmax.f32 %v2717_v43, %v2718_v3 }
 0x1e0   :  { %v2455_v63 = vadd.f32 %v2454_v6, %v2358_v28  ;;  %v3304_v46 = vpop.f32.mrf.mxu0 }
 0x1e1   :  { %v2737_v52 = vrot.slane %v2736_v2, 2  ;;  %v2623_v23 = vmul.f32 %v4787_v33, %v2569_v18  ;;  %v2361_v40 = vadd.f32 %v3303_v42, %v3239_v31  ;;  %v2854_v41 = vsel %vm2835_vm3, %v2719_v17, %v2853_v8 }
 0x1e2   :  { %v2524_v12 = vadd.f32 %v4523_v29, %v2455_v63  ;;  %v3305_v0 = vpop.f32.mrf.mxu0 }
 0x1e3   :  { %v2738_v54 = vmax.f32 %v2736_v2, %v2737_v52  ;;  %v3306_v26 = vadd.f32 %v3305_v0, %v3304_v46  ;;  %v2458_v19 = vadd.f32 %v2457_v47, %v2361_v40  ;;  %v2755_v45 = vmax.f32 %v2620_v21, %v2623_v23  ;;  %v4927_v52 = vld [vmem:[#allocation9_spill] sm:$0xff] }
 0x1e4   :  { %v3307_v56 = vpop.f32.mrf.mxu0  ;;  %v2572_v51 = vmax.f32 %v2524_v12, 0.0  ;;  %v4928_v23 = vsub.s32 0, %v4927_v52 }
 0x1e5   :  { %v2739_v55 = vrot.slane %v2738_v54, 1  ;;  %v2366_v24 = vadd.f32 %v3306_v26, %v3242_v32  ;;  %v2527_v7 = vadd.f32 %v4523_v29, %v2458_v19  ;;  %v2756_v57 = vrot.slane %v2755_v45, 4 }
 0x1e6   :  { %v3308_v35 = vpop.f32.mrf.mxu0  ;;  %v2626_v22 = vmul.f32 %v4782_v58, %v2572_v51 }
 0x1e7   :  { %v2740_v27 = vmax.f32 %v2738_v54, %v2739_v55  ;;  %v2463_v20 = vadd.f32 %v3358_v37, %v2366_v24  ;;  %v2575_v30 = vmax.f32 %v2527_v7, 0.0  ;;  %v3309_v13 = vadd.f32 %v3308_v35, %v3307_v56 }
 0x1e8   :  { %v2757_v9 = vmax.f32 %v2755_v45, %v2756_v57 }
 0x1e9   :  { %v2629_v48 = vmul.f32 %v4787_v33, %v2575_v30  ;;  %v2855_v6 = vsel %vm2837_vm4, %v2740_v27, %v2854_v41  ;;  %v2530_v14 = vadd.f32 %v4523_v29, %v2463_v20  ;;  %v2369_v5 = vadd.f32 %v3309_v13, %v3245_v38 }
 0x1ea   :  { %v2758_v50 = vrot.slane %v2757_v9, 2 }
 0x1eb   :  { %v2776_v15 = vmax.f32 %v2626_v22, %v2629_v48  ;;  %v2466_v62 = vadd.f32 %v3359_v44, %v2369_v5  ;;  %v2578_v37 = vmax.f32 %v2530_v14, 0.0 }
 0x1ec   :  { %v2759_v3 = vmax.f32 %v2757_v9, %v2758_v50 }
 0x1ed   :  { %v2777_v25 = vrot.slane %v2776_v15, 4  ;;  %v2533_v8 = vadd.f32 %v4523_v29, %v2466_v62  ;;  %v2632_v59 = vmul.f32 %v4782_v58, %v2578_v37 }
 0x1ee   :  { %v2760_v11 = vrot.slane %v2759_v3, 1 }
 0x1ef   :  { %v2778_v43 = vmax.f32 %v2776_v15, %v2777_v25  ;;  %v2581_v39 = vmax.f32 %v2533_v8, 0.0 }
 0x1f0   :  { %v2761_v34 = vmax.f32 %v2759_v3, %v2760_v11 }
 0x1f1   :  { %v2779_v10 = vrot.slane %v2778_v43, 2  ;;  %v2635_v61 = vmul.f32 %v4787_v33, %v2581_v39  ;;  %v2806_v33 = vld [vmem:[%s4875_s4 + $0x10] sm:$0xff] }
 0x1f2   :  { %v2856_v42 = vsel %vm2839_vm5, %v2761_v34, %v2855_v6 }
 0x1f3   :  { %v2797_v49 = vmax.f32 %v2632_v59, %v2635_v61  ;;  %v2780_v1 = vmax.f32 %v2778_v43, %v2779_v10 }
 0x1f5   :  { %v2798_v4 = vrot.slane %v2797_v49, 4  ;;  %v2781_v36 = vrot.slane %v2780_v1, 1 }
 0x1f7   :  { %v2799_v31 = vmax.f32 %v2797_v49, %v2798_v4  ;;  %v2782_v2 = vmax.f32 %v2780_v1, %v2781_v36 }
 0x1f9   :  { %v2800_v44 = vrot.slane %v2799_v31, 2  ;;  %v2857_v17 = vsel %vm2841_vm6, %v2782_v2, %v2856_v42 }
 0x1fb   :  { %v2801_v28 = vmax.f32 %v2799_v31, %v2800_v44 }
 0x1fc   :  { %v3006_v47 = vpop.permute.xlu0 %3005 }
 0x1fd   :  { %v2802_v29 = vrot.slane %v2801_v28, 1  ;;  %v3011_v40 = vrot.slane %v3006_v47, %v4928_v23 }
 0x1ff   :  { %v2803_v18 = vmax.f32 %v2801_v28, %v2802_v29 }
 0x201   :  { %v2858_v58 = vsel %vm2843_vm7, %v2803_v18, %v2857_v17 }
 0x202   :  { %3361 = vmatpush3.xpose.msra.mxu1 %v2858_v58 }
 0x205   :  { %3363 = vmatmul.mubr.f32.vlgmr.msra.gmra.mxu1 %v2806_v33 }
 0x283   :  { %v2928_v63 = vpop.f32.mrf.mxu1 }
 0x285   :  { %v2930_v46 = vpop.f32.mrf.mxu1 }
 0x2c5   :  { %v2998_v41 = vpop.f32.mrf.mxu1 }
 0x2c6   :  { %v2999_v21 = vadd.f32 %v2998_v41, %v2928_v63 }
 0x2c7   :  { %v3364_v12 = vpop.f32.mrf.mxu1 }
 0x2c8   :  { %v3012_v0 = vadd.f32 %v3011_v40, %v2999_v21 }
 0x2ca   :  { %3014 = vst.msk [vmem:[%s4877_s6] sm:$0x1] %vm3013_vm9, %v3012_v0 }
 0x2cb   :  { %3019 = vsyncpa [#allocation5], 1 }

</bundles_post_ra>
